<compile_context>
chip_gen: v5e
topology: v5e:2x2
jax: 0.10.0
libtpu: 0.0.40
codegen_flags: <defaults>
</compile_context>

<pallas_src>
import functools

import numpy as np
import jax
import jax.numpy as jnp
from jax.experimental import pallas as pl
from jax.experimental.pallas import tpu as pltpu


# --------------------------------------------------------------------------- #
# Host-side (numpy) index / run computation, cached per (out_size, in_size).
# --------------------------------------------------------------------------- #
def _as_pair(size):
    if isinstance(size, (tuple, list)):
        assert len(size) == 2
        return (int(size[0]), int(size[1]))
    return (int(size), int(size))


def _round_up(x, m):
    return ((x + m - 1) // m) * m


def _sublane_multiple(dtype):
    # f32 -> 8 rows per sublane tile, bf16 -> 16, int8/fp8 -> 32.
    return max(8, 32 // max(jnp.dtype(dtype).itemsize, 1))


@functools.lru_cache(maxsize=None)
def _nearest_index(out_size, in_size):
    # PyTorch 'nearest': src = floor(dst * (in/out)), clamped to in_size-1.
    # TODO(synk): torch computes the scale in float32 for float inputs; for some
    # pathological non-integer ratios that can differ by one index from the
    # float64 floor used here.
    dst = np.arange(out_size, dtype=np.float64)
    idx = np.floor(dst * (float(in_size) / float(out_size))).astype(np.int64)
    idx = np.minimum(idx, in_size - 1)
    return tuple(int(i) for i in idx)


@functools.lru_cache(maxsize=None)
def _nearest_runs(out_size, in_size):
    """Group output indices into (src, start, length) runs of equal source."""
    idx = _nearest_index(out_size, in_size)
    runs = []
    start = 0
    for i in range(1, out_size + 1):
        if i == out_size or idx[i] != idx[start]:
            runs.append((idx[start], start, i - start))
            start = i
    return tuple(runs)


# --------------------------------------------------------------------------- #
# Hardware probing (best effort, safe fallbacks).
# --------------------------------------------------------------------------- #
def _vmem_capacity_bytes():
    try:
        info = pltpu.get_tpu_info()
        for name in ("vmem_capacity_bytes", "vmem_bytes", "vmem_size_bytes"):
            v = getattr(info, name, None)
            if v:
                return int(v)
    except Exception:
        pass
    return 64 * 1024 * 1024  # conservative: v7x has 64 MiB / TensorCore


def _num_tensorcores():
    try:
        d = jax.devices()[0]
        for name in ("num_cores", "core_count"):
            v = getattr(d, name, None)
            if isinstance(v, int) and 1 <= v <= 8:
                return v
    except Exception:
        pass
    return 1


# --------------------------------------------------------------------------- #
# Kernel factory: exact copy/broadcast nearest selection on a block of planes.
# --------------------------------------------------------------------------- #
def _make_nearest_kernel(tb, h_in, w_in, h_out, w_out, w_runs, h_runs):
    w_identity = (w_out == w_in) and all(k == s and l == 1 for (k, s, l) in w_runs)
    h_identity = (h_out == h_in) and all(k == s and l == 1 for (k, s, l) in h_runs)

    def kernel(x_ref, o_ref):
        x = x_ref[...]                                        # (tb, h_in, w_in)

        # W direction: per-source-column broadcasts, concatenated along lanes.
        if w_identity:
            t = x
        else:
            pieces = [
                jnp.broadcast_to(x[:, :, k:k + 1], (tb, h_in, l))
                for (k, _start, l) in w_runs
            ]
            t = pieces[0] if len(pieces) == 1 else jnp.concatenate(pieces, axis=2)

        # H direction: per-source-row broadcast stores (static row runs).
        if h_identity:
            o_ref[...] = t
        else:
            for (k, start, l) in h_runs:
                o_ref[:, start:start + l, :] = jnp.broadcast_to(
                    t[:, k:k + 1, :], (tb, l, w_out))

    return kernel


# --------------------------------------------------------------------------- #
# Public wrapper (matches the PyTorch Interpolate module's forward).
# --------------------------------------------------------------------------- #
def interpolate_nearest(x, in_size, out_size):
    """x: (N, C, H_in, W_in) NCHW. Returns (N, C, H_out, W_out), mode='nearest'."""
    in_size = _as_pair(in_size)
    out_size = _as_pair(out_size)
    if in_size == out_size:
        return x  # identity, matching the PyTorch module

    assert x.ndim == 4, "expected NCHW input"
    N, C, H_in, W_in = x.shape
    assert (H_in, W_in) == in_size, "input spatial dims must match in_size"
    H_out, W_out = out_size
    B = N * C
    dtype = x.dtype
    itemsize = jnp.dtype(dtype).itemsize

    w_runs = _nearest_runs(W_out, W_in)
    h_runs = _nearest_runs(H_out, H_in)

    # ---- planes per grid step (TB), generation-aware -------------------------
    lane = 128
    in_plane = H_in * _round_up(W_in, lane) * itemsize     # VMEM footprint (lane padded)
    out_plane = H_out * _round_up(W_out, lane) * itemsize
    tmp_plane = H_in * _round_up(W_out, lane) * itemsize   # W-replicated intermediate
    per_plane = 2 * (in_plane + out_plane) + 2 * tmp_plane  # dbl-buffered blocks + temps

    vmem_cap = _vmem_capacity_bytes()
    budget = int(vmem_cap * 0.45)
    TB = max(1, budget // per_plane)

    sub = _sublane_multiple(dtype)
    ncores = _num_tensorcores()
    if ncores > 1 and B >= ncores * sub:
        # Even split across TensorCores when the whole batch would fit one step.
        TB = min(TB, _round_up(-(-B // ncores), sub))
    if TB < B:
        TB = max(sub, (TB // sub) * sub)   # tidy leading-dim multiple (H is the sublane dim)
    TB = min(TB, B)

    grid = (pl.cdiv(B, TB),)
    need = TB * per_plane
    vmem_limit = int(min(0.9 * vmem_cap, 128 * 1024 * 1024,
                         max(2 * need, 32 * 1024 * 1024)))

    kernel = _make_nearest_kernel(TB, H_in, W_in, H_out, W_out, w_runs, h_runs)

    cost = pl.CostEstimate(
        flops=int(B * H_out * W_out),  # pure copy: ~1 op per output element
        transcendentals=0,
        bytes_accessed=int(B * (H_in * W_in + H_out * W_out) * itemsize),
    )

    out3 = pl.pallas_call(
        kernel,
        out_shape=jax.ShapeDtypeStruct((B, H_out, W_out), dtype),
        grid_spec=pltpu.PrefetchScalarGridSpec(
            num_scalar_prefetch=0,
            grid=grid,
            in_specs=[pl.BlockSpec((TB, H_in, W_in), lambda b: (b, 0, 0))],
            out_specs=pl.BlockSpec((TB, H_out, W_out), lambda b: (b, 0, 0)),
        ),
        compiler_params=pltpu.CompilerParams(
            dimension_semantics=("parallel",),
            vmem_limit_bytes=vmem_limit,
        ),
        cost_estimate=cost,
    )(x.reshape(B, H_in, W_in))

    return out3.reshape(N, C, H_out, W_out)


# --------------------------------------------------------------------------- #
# Pure-JAX reference (same semantics as torch interpolate mode='nearest').
# --------------------------------------------------------------------------- #
def _reference_nearest(x, out_size):
    H_out, W_out = _as_pair(out_size)
    H_in, W_in = x.shape[-2:]
    hi = np.asarray(_nearest_index(H_out, H_in))
    wi = np.asarray(_nearest_index(W_out, W_in))
    return x[:, :, hi, :][:, :, :, wi]


if __name__ == "__main__":
    key = jax.random.PRNGKey(0)
    N, C = 2, 4
    in_size, out_size = 16, 32

    x = jax.random.normal(key, (N, C, in_size, in_size), dtype=jnp.float32)

    # f32 upsample 16 -> 32 : bit-exact copy path
    out = jax.block_until_ready(interpolate_nearest(x, in_size, out_size))
    assert out.shape == (N, C, out_size, out_size), out.shape
    assert bool(jnp.array_equal(out, _reference_nearest(x, out_size))), "f32 mismatch"

    # bf16 : still bit-exact (no MXU, no casts)
    xb = x.astype(jnp.bfloat16)
    outb = jax.block_until_ready(interpolate_nearest(xb, in_size, out_size))
    assert outb.dtype == jnp.bfloat16
    assert bool(jnp.array_equal(outb, _reference_nearest(xb, out_size))), "bf16 mismatch"

    # int32 : exact (no float round-trip)
    xi = jax.random.randint(jax.random.PRNGKey(1), (N, C, in_size, in_size),
                            -1_000_000, 1_000_000, dtype=jnp.int32)
    outi = jax.block_until_ready(interpolate_nearest(xi, in_size, out_size))
    assert bool(jnp.array_equal(outi, _reference_nearest(xi, out_size))), "int32 mismatch"

    # downsample 32 -> 16 (length-1 runs, unused sources)
    outd = jax.block_until_ready(interpolate_nearest(out, out_size, in_size))
    assert bool(jnp.array_equal(outd, _reference_nearest(out, in_size))), "downsample mismatch"

    # non-integer scale 16 -> 24 (mixed run lengths)
    outn = jax.block_until_ready(interpolate_nearest(x, in_size, 24))
    assert bool(jnp.array_equal(outn, _reference_nearest(x, 24))), "16->24 mismatch"

    # identity path (in_size == out_size)
    out_id = jax.block_until_ready(interpolate_nearest(x, in_size, in_size))
    assert bool(jnp.array_equal(out_id, x))

    print("KERNEL_OK")
</pallas_src>

<mosaic_0001>
module attributes {stable_mosaic.version = 11 : i64} {
  func.func @kernel(%arg0: i32, %arg1: memref<8x16x16xf32, #tpu.memory_space<vmem>>, %arg2: memref<8x32x32xf32, #tpu.memory_space<vmem>>) attributes {dimension_semantics = [#tpu.dimension_semantics<parallel>], iteration_bounds = array<i64: 1>, scalar_prefetch = 0 : i64, scratch_operands = 0 : i64, tpu.core_type = #tpu.core_type<tc>, window_params = [{transform_indices = @transform_0, window_bounds = array<i64: 8, 16, 16>}, {transform_indices = @transform_1, window_bounds = array<i64: 8, 32, 32>}]} {
    %c0 = arith.constant 0 : index
    %c0_0 = arith.constant 0 : index
    %c0_1 = arith.constant 0 : index
    %0 = vector.load %arg1[%c0, %c0_0, %c0_1] : memref<8x16x16xf32, #tpu.memory_space<vmem>>, vector<8x16x16xf32>
    %1 = vector.extract_strided_slice %0 {offsets = [0, 0, 0], sizes = [8, 16, 1], strides = [1, 1, 1]} : vector<8x16x16xf32> to vector<8x16x1xf32>
    %2 = vector.shape_cast %1 : vector<8x16x1xf32> to vector<8x16x1xf32>
    %3 = vector.broadcast %2 : vector<8x16x1xf32> to vector<8x16x2xf32>
    %4 = vector.extract_strided_slice %0 {offsets = [0, 0, 1], sizes = [8, 16, 1], strides = [1, 1, 1]} : vector<8x16x16xf32> to vector<8x16x1xf32>
    %5 = vector.shape_cast %4 : vector<8x16x1xf32> to vector<8x16x1xf32>
    %6 = vector.broadcast %5 : vector<8x16x1xf32> to vector<8x16x2xf32>
    %7 = vector.extract_strided_slice %0 {offsets = [0, 0, 2], sizes = [8, 16, 1], strides = [1, 1, 1]} : vector<8x16x16xf32> to vector<8x16x1xf32>
    %8 = vector.shape_cast %7 : vector<8x16x1xf32> to vector<8x16x1xf32>
    %9 = vector.broadcast %8 : vector<8x16x1xf32> to vector<8x16x2xf32>
    %10 = vector.extract_strided_slice %0 {offsets = [0, 0, 3], sizes = [8, 16, 1], strides = [1, 1, 1]} : vector<8x16x16xf32> to vector<8x16x1xf32>
    %11 = vector.shape_cast %10 : vector<8x16x1xf32> to vector<8x16x1xf32>
    %12 = vector.broadcast %11 : vector<8x16x1xf32> to vector<8x16x2xf32>
    %13 = vector.extract_strided_slice %0 {offsets = [0, 0, 4], sizes = [8, 16, 1], strides = [1, 1, 1]} : vector<8x16x16xf32> to vector<8x16x1xf32>
    %14 = vector.shape_cast %13 : vector<8x16x1xf32> to vector<8x16x1xf32>
    %15 = vector.broadcast %14 : vector<8x16x1xf32> to vector<8x16x2xf32>
    %16 = vector.extract_strided_slice %0 {offsets = [0, 0, 5], sizes = [8, 16, 1], strides = [1, 1, 1]} : vector<8x16x16xf32> to vector<8x16x1xf32>
    %17 = vector.shape_cast %16 : vector<8x16x1xf32> to vector<8x16x1xf32>
    %18 = vector.broadcast %17 : vector<8x16x1xf32> to vector<8x16x2xf32>
    %19 = vector.extract_strided_slice %0 {offsets = [0, 0, 6], sizes = [8, 16, 1], strides = [1, 1, 1]} : vector<8x16x16xf32> to vector<8x16x1xf32>
    %20 = vector.shape_cast %19 : vector<8x16x1xf32> to vector<8x16x1xf32>
    %21 = vector.broadcast %20 : vector<8x16x1xf32> to vector<8x16x2xf32>
    %22 = vector.extract_strided_slice %0 {offsets = [0, 0, 7], sizes = [8, 16, 1], strides = [1, 1, 1]} : vector<8x16x16xf32> to vector<8x16x1xf32>
    %23 = vector.shape_cast %22 : vector<8x16x1xf32> to vector<8x16x1xf32>
    %24 = vector.broadcast %23 : vector<8x16x1xf32> to vector<8x16x2xf32>
    %25 = vector.extract_strided_slice %0 {offsets = [0, 0, 8], sizes = [8, 16, 1], strides = [1, 1, 1]} : vector<8x16x16xf32> to vector<8x16x1xf32>
    %26 = vector.shape_cast %25 : vector<8x16x1xf32> to vector<8x16x1xf32>
    %27 = vector.broadcast %26 : vector<8x16x1xf32> to vector<8x16x2xf32>
    %28 = vector.extract_strided_slice %0 {offsets = [0, 0, 9], sizes = [8, 16, 1], strides = [1, 1, 1]} : vector<8x16x16xf32> to vector<8x16x1xf32>
    %29 = vector.shape_cast %28 : vector<8x16x1xf32> to vector<8x16x1xf32>
    %30 = vector.broadcast %29 : vector<8x16x1xf32> to vector<8x16x2xf32>
    %31 = vector.extract_strided_slice %0 {offsets = [0, 0, 10], sizes = [8, 16, 1], strides = [1, 1, 1]} : vector<8x16x16xf32> to vector<8x16x1xf32>
    %32 = vector.shape_cast %31 : vector<8x16x1xf32> to vector<8x16x1xf32>
    %33 = vector.broadcast %32 : vector<8x16x1xf32> to vector<8x16x2xf32>
    %34 = vector.extract_strided_slice %0 {offsets = [0, 0, 11], sizes = [8, 16, 1], strides = [1, 1, 1]} : vector<8x16x16xf32> to vector<8x16x1xf32>
    %35 = vector.shape_cast %34 : vector<8x16x1xf32> to vector<8x16x1xf32>
    %36 = vector.broadcast %35 : vector<8x16x1xf32> to vector<8x16x2xf32>
    %37 = vector.extract_strided_slice %0 {offsets = [0, 0, 12], sizes = [8, 16, 1], strides = [1, 1, 1]} : vector<8x16x16xf32> to vector<8x16x1xf32>
    %38 = vector.shape_cast %37 : vector<8x16x1xf32> to vector<8x16x1xf32>
    %39 = vector.broadcast %38 : vector<8x16x1xf32> to vector<8x16x2xf32>
    %40 = vector.extract_strided_slice %0 {offsets = [0, 0, 13], sizes = [8, 16, 1], strides = [1, 1, 1]} : vector<8x16x16xf32> to vector<8x16x1xf32>
    %41 = vector.shape_cast %40 : vector<8x16x1xf32> to vector<8x16x1xf32>
    %42 = vector.broadcast %41 : vector<8x16x1xf32> to vector<8x16x2xf32>
    %43 = vector.extract_strided_slice %0 {offsets = [0, 0, 14], sizes = [8, 16, 1], strides = [1, 1, 1]} : vector<8x16x16xf32> to vector<8x16x1xf32>
    %44 = vector.shape_cast %43 : vector<8x16x1xf32> to vector<8x16x1xf32>
    %45 = vector.broadcast %44 : vector<8x16x1xf32> to vector<8x16x2xf32>
    %46 = vector.extract_strided_slice %0 {offsets = [0, 0, 15], sizes = [8, 16, 1], strides = [1, 1, 1]} : vector<8x16x16xf32> to vector<8x16x1xf32>
    %47 = vector.shape_cast %46 : vector<8x16x1xf32> to vector<8x16x1xf32>
    %48 = vector.broadcast %47 : vector<8x16x1xf32> to vector<8x16x2xf32>
    %49 = tpu.concatenate %3, %6, %9, %12, %15, %18, %21, %24, %27, %30, %33, %36, %39, %42, %45, %48 in 2 : vector<8x16x2xf32>, vector<8x16x2xf32>, vector<8x16x2xf32>, vector<8x16x2xf32>, vector<8x16x2xf32>, vector<8x16x2xf32>, vector<8x16x2xf32>, vector<8x16x2xf32>, vector<8x16x2xf32>, vector<8x16x2xf32>, vector<8x16x2xf32>, vector<8x16x2xf32>, vector<8x16x2xf32>, vector<8x16x2xf32>, vector<8x16x2xf32>, vector<8x16x2xf32> -> vector<8x16x32xf32>
    %50 = vector.extract_strided_slice %49 {offsets = [0, 0, 0], sizes = [8, 1, 32], strides = [1, 1, 1]} : vector<8x16x32xf32> to vector<8x1x32xf32>
    %51 = vector.shape_cast %50 : vector<8x1x32xf32> to vector<8x1x32xf32>
    %52 = vector.broadcast %51 : vector<8x1x32xf32> to vector<8x2x32xf32>
    %c0_2 = arith.constant 0 : index
    %c0_3 = arith.constant 0 : index
    %c0_4 = arith.constant 0 : index
    %53 = vector.load %arg2[%c0_2, %c0_3, %c0_4] : memref<8x32x32xf32, #tpu.memory_space<vmem>>, vector<8x2x32xf32>
    tpu.vector_store %arg2[%c0_2, %c0_3, %c0_4], %52 {strides = array<i32>} : memref<8x32x32xf32, #tpu.memory_space<vmem>>, vector<8x2x32xf32>,
    %54 = vector.extract_strided_slice %49 {offsets = [0, 1, 0], sizes = [8, 1, 32], strides = [1, 1, 1]} : vector<8x16x32xf32> to vector<8x1x32xf32>
    %55 = vector.shape_cast %54 : vector<8x1x32xf32> to vector<8x1x32xf32>
    %56 = vector.broadcast %55 : vector<8x1x32xf32> to vector<8x2x32xf32>
    %c0_5 = arith.constant 0 : index
    %c2 = arith.constant 2 : index
    %c0_6 = arith.constant 0 : index
    %57 = vector.load %arg2[%c0_5, %c2, %c0_6] : memref<8x32x32xf32, #tpu.memory_space<vmem>>, vector<8x2x32xf32>
    tpu.vector_store %arg2[%c0_5, %c2, %c0_6], %56 {strides = array<i32>} : memref<8x32x32xf32, #tpu.memory_space<vmem>>, vector<8x2x32xf32>,
    %58 = vector.extract_strided_slice %49 {offsets = [0, 2, 0], sizes = [8, 1, 32], strides = [1, 1, 1]} : vector<8x16x32xf32> to vector<8x1x32xf32>
    %59 = vector.shape_cast %58 : vector<8x1x32xf32> to vector<8x1x32xf32>
    %60 = vector.broadcast %59 : vector<8x1x32xf32> to vector<8x2x32xf32>
    %c0_7 = arith.constant 0 : index
    %c4 = arith.constant 4 : index
    %c0_8 = arith.constant 0 : index
    %61 = vector.load %arg2[%c0_7, %c4, %c0_8] : memref<8x32x32xf32, #tpu.memory_space<vmem>>, vector<8x2x32xf32>
    tpu.vector_store %arg2[%c0_7, %c4, %c0_8], %60 {strides = array<i32>} : memref<8x32x32xf32, #tpu.memory_space<vmem>>, vector<8x2x32xf32>,
    %62 = vector.extract_strided_slice %49 {offsets = [0, 3, 0], sizes = [8, 1, 32], strides = [1, 1, 1]} : vector<8x16x32xf32> to vector<8x1x32xf32>
    %63 = vector.shape_cast %62 : vector<8x1x32xf32> to vector<8x1x32xf32>
    %64 = vector.broadcast %63 : vector<8x1x32xf32> to vector<8x2x32xf32>
    %c0_9 = arith.constant 0 : index
    %c6 = arith.constant 6 : index
    %c0_10 = arith.constant 0 : index
    %65 = vector.load %arg2[%c0_9, %c6, %c0_10] : memref<8x32x32xf32, #tpu.memory_space<vmem>>, vector<8x2x32xf32>
    tpu.vector_store %arg2[%c0_9, %c6, %c0_10], %64 {strides = array<i32>} : memref<8x32x32xf32, #tpu.memory_space<vmem>>, vector<8x2x32xf32>,
    %66 = vector.extract_strided_slice %49 {offsets = [0, 4, 0], sizes = [8, 1, 32], strides = [1, 1, 1]} : vector<8x16x32xf32> to vector<8x1x32xf32>
    %67 = vector.shape_cast %66 : vector<8x1x32xf32> to vector<8x1x32xf32>
    %68 = vector.broadcast %67 : vector<8x1x32xf32> to vector<8x2x32xf32>
    %c0_11 = arith.constant 0 : index
    %c8 = arith.constant 8 : index
    %c0_12 = arith.constant 0 : index
    %69 = vector.load %arg2[%c0_11, %c8, %c0_12] : memref<8x32x32xf32, #tpu.memory_space<vmem>>, vector<8x2x32xf32>
    tpu.vector_store %arg2[%c0_11, %c8, %c0_12], %68 {strides = array<i32>} : memref<8x32x32xf32, #tpu.memory_space<vmem>>, vector<8x2x32xf32>,
    %70 = vector.extract_strided_slice %49 {offsets = [0, 5, 0], sizes = [8, 1, 32], strides = [1, 1, 1]} : vector<8x16x32xf32> to vector<8x1x32xf32>
    %71 = vector.shape_cast %70 : vector<8x1x32xf32> to vector<8x1x32xf32>
    %72 = vector.broadcast %71 : vector<8x1x32xf32> to vector<8x2x32xf32>
    %c0_13 = arith.constant 0 : index
    %c10 = arith.constant 10 : index
    %c0_14 = arith.constant 0 : index
    %73 = vector.load %arg2[%c0_13, %c10, %c0_14] : memref<8x32x32xf32, #tpu.memory_space<vmem>>, vector<8x2x32xf32>
    tpu.vector_store %arg2[%c0_13, %c10, %c0_14], %72 {strides = array<i32>} : memref<8x32x32xf32, #tpu.memory_space<vmem>>, vector<8x2x32xf32>,
    %74 = vector.extract_strided_slice %49 {offsets = [0, 6, 0], sizes = [8, 1, 32], strides = [1, 1, 1]} : vector<8x16x32xf32> to vector<8x1x32xf32>
    %75 = vector.shape_cast %74 : vector<8x1x32xf32> to vector<8x1x32xf32>
    %76 = vector.broadcast %75 : vector<8x1x32xf32> to vector<8x2x32xf32>
    %c0_15 = arith.constant 0 : index
    %c12 = arith.constant 12 : index
    %c0_16 = arith.constant 0 : index
    %77 = vector.load %arg2[%c0_15, %c12, %c0_16] : memref<8x32x32xf32, #tpu.memory_space<vmem>>, vector<8x2x32xf32>
    tpu.vector_store %arg2[%c0_15, %c12, %c0_16], %76 {strides = array<i32>} : memref<8x32x32xf32, #tpu.memory_space<vmem>>, vector<8x2x32xf32>,
    %78 = vector.extract_strided_slice %49 {offsets = [0, 7, 0], sizes = [8, 1, 32], strides = [1, 1, 1]} : vector<8x16x32xf32> to vector<8x1x32xf32>
    %79 = vector.shape_cast %78 : vector<8x1x32xf32> to vector<8x1x32xf32>
    %80 = vector.broadcast %79 : vector<8x1x32xf32> to vector<8x2x32xf32>
    %c0_17 = arith.constant 0 : index
    %c14 = arith.constant 14 : index
    %c0_18 = arith.constant 0 : index
    %81 = vector.load %arg2[%c0_17, %c14, %c0_18] : memref<8x32x32xf32, #tpu.memory_space<vmem>>, vector<8x2x32xf32>
    tpu.vector_store %arg2[%c0_17, %c14, %c0_18], %80 {strides = array<i32>} : memref<8x32x32xf32, #tpu.memory_space<vmem>>, vector<8x2x32xf32>,
    %82 = vector.extract_strided_slice %49 {offsets = [0, 8, 0], sizes = [8, 1, 32], strides = [1, 1, 1]} : vector<8x16x32xf32> to vector<8x1x32xf32>
    %83 = vector.shape_cast %82 : vector<8x1x32xf32> to vector<8x1x32xf32>
    %84 = vector.broadcast %83 : vector<8x1x32xf32> to vector<8x2x32xf32>
    %c0_19 = arith.constant 0 : index
    %c16 = arith.constant 16 : index
    %c0_20 = arith.constant 0 : index
    %85 = vector.load %arg2[%c0_19, %c16, %c0_20] : memref<8x32x32xf32, #tpu.memory_space<vmem>>, vector<8x2x32xf32>
    tpu.vector_store %arg2[%c0_19, %c16, %c0_20], %84 {strides = array<i32>} : memref<8x32x32xf32, #tpu.memory_space<vmem>>, vector<8x2x32xf32>,
    %86 = vector.extract_strided_slice %49 {offsets = [0, 9, 0], sizes = [8, 1, 32], strides = [1, 1, 1]} : vector<8x16x32xf32> to vector<8x1x32xf32>
    %87 = vector.shape_cast %86 : vector<8x1x32xf32> to vector<8x1x32xf32>
    %88 = vector.broadcast %87 : vector<8x1x32xf32> to vector<8x2x32xf32>
    %c0_21 = arith.constant 0 : index
    %c18 = arith.constant 18 : index
    %c0_22 = arith.constant 0 : index
    %89 = vector.load %arg2[%c0_21, %c18, %c0_22] : memref<8x32x32xf32, #tpu.memory_space<vmem>>, vector<8x2x32xf32>
    tpu.vector_store %arg2[%c0_21, %c18, %c0_22], %88 {strides = array<i32>} : memref<8x32x32xf32, #tpu.memory_space<vmem>>, vector<8x2x32xf32>,
    %90 = vector.extract_strided_slice %49 {offsets = [0, 10, 0], sizes = [8, 1, 32], strides = [1, 1, 1]} : vector<8x16x32xf32> to vector<8x1x32xf32>
    %91 = vector.shape_cast %90 : vector<8x1x32xf32> to vector<8x1x32xf32>
    %92 = vector.broadcast %91 : vector<8x1x32xf32> to vector<8x2x32xf32>
    %c0_23 = arith.constant 0 : index
    %c20 = arith.constant 20 : index
    %c0_24 = arith.constant 0 : index
    %93 = vector.load %arg2[%c0_23, %c20, %c0_24] : memref<8x32x32xf32, #tpu.memory_space<vmem>>, vector<8x2x32xf32>
    tpu.vector_store %arg2[%c0_23, %c20, %c0_24], %92 {strides = array<i32>} : memref<8x32x32xf32, #tpu.memory_space<vmem>>, vector<8x2x32xf32>,
    %94 = vector.extract_strided_slice %49 {offsets = [0, 11, 0], sizes = [8, 1, 32], strides = [1, 1, 1]} : vector<8x16x32xf32> to vector<8x1x32xf32>
    %95 = vector.shape_cast %94 : vector<8x1x32xf32> to vector<8x1x32xf32>
    %96 = vector.broadcast %95 : vector<8x1x32xf32> to vector<8x2x32xf32>
    %c0_25 = arith.constant 0 : index
    %c22 = arith.constant 22 : index
    %c0_26 = arith.constant 0 : index
    %97 = vector.load %arg2[%c0_25, %c22, %c0_26] : memref<8x32x32xf32, #tpu.memory_space<vmem>>, vector<8x2x32xf32>
    tpu.vector_store %arg2[%c0_25, %c22, %c0_26], %96 {strides = array<i32>} : memref<8x32x32xf32, #tpu.memory_space<vmem>>, vector<8x2x32xf32>,
    %98 = vector.extract_strided_slice %49 {offsets = [0, 12, 0], sizes = [8, 1, 32], strides = [1, 1, 1]} : vector<8x16x32xf32> to vector<8x1x32xf32>
    %99 = vector.shape_cast %98 : vector<8x1x32xf32> to vector<8x1x32xf32>
    %100 = vector.broadcast %99 : vector<8x1x32xf32> to vector<8x2x32xf32>
    %c0_27 = arith.constant 0 : index
    %c24 = arith.constant 24 : index
    %c0_28 = arith.constant 0 : index
    %101 = vector.load %arg2[%c0_27, %c24, %c0_28] : memref<8x32x32xf32, #tpu.memory_space<vmem>>, vector<8x2x32xf32>
    tpu.vector_store %arg2[%c0_27, %c24, %c0_28], %100 {strides = array<i32>} : memref<8x32x32xf32, #tpu.memory_space<vmem>>, vector<8x2x32xf32>,
    %102 = vector.extract_strided_slice %49 {offsets = [0, 13, 0], sizes = [8, 1, 32], strides = [1, 1, 1]} : vector<8x16x32xf32> to vector<8x1x32xf32>
    %103 = vector.shape_cast %102 : vector<8x1x32xf32> to vector<8x1x32xf32>
    %104 = vector.broadcast %103 : vector<8x1x32xf32> to vector<8x2x32xf32>
    %c0_29 = arith.constant 0 : index
    %c26 = arith.constant 26 : index
    %c0_30 = arith.constant 0 : index
    %105 = vector.load %arg2[%c0_29, %c26, %c0_30] : memref<8x32x32xf32, #tpu.memory_space<vmem>>, vector<8x2x32xf32>
    tpu.vector_store %arg2[%c0_29, %c26, %c0_30], %104 {strides = array<i32>} : memref<8x32x32xf32, #tpu.memory_space<vmem>>, vector<8x2x32xf32>,
    %106 = vector.extract_strided_slice %49 {offsets = [0, 14, 0], sizes = [8, 1, 32], strides = [1, 1, 1]} : vector<8x16x32xf32> to vector<8x1x32xf32>
    %107 = vector.shape_cast %106 : vector<8x1x32xf32> to vector<8x1x32xf32>
    %108 = vector.broadcast %107 : vector<8x1x32xf32> to vector<8x2x32xf32>
    %c0_31 = arith.constant 0 : index
    %c28 = arith.constant 28 : index
    %c0_32 = arith.constant 0 : index
    %109 = vector.load %arg2[%c0_31, %c28, %c0_32] : memref<8x32x32xf32, #tpu.memory_space<vmem>>, vector<8x2x32xf32>
    tpu.vector_store %arg2[%c0_31, %c28, %c0_32], %108 {strides = array<i32>} : memref<8x32x32xf32, #tpu.memory_space<vmem>>, vector<8x2x32xf32>,
    %110 = vector.extract_strided_slice %49 {offsets = [0, 15, 0], sizes = [8, 1, 32], strides = [1, 1, 1]} : vector<8x16x32xf32> to vector<8x1x32xf32>
    %111 = vector.shape_cast %110 : vector<8x1x32xf32> to vector<8x1x32xf32>
    %112 = vector.broadcast %111 : vector<8x1x32xf32> to vector<8x2x32xf32>
    %c0_33 = arith.constant 0 : index
    %c30 = arith.constant 30 : index
    %c0_34 = arith.constant 0 : index
    %113 = vector.load %arg2[%c0_33, %c30, %c0_34] : memref<8x32x32xf32, #tpu.memory_space<vmem>>, vector<8x2x32xf32>
    tpu.vector_store %arg2[%c0_33, %c30, %c0_34], %112 {strides = array<i32>} : memref<8x32x32xf32, #tpu.memory_space<vmem>>, vector<8x2x32xf32>,
    return
  }
  func.func @transform_0(%arg0: i32) -> (i32, i32, i32) {
    %c0_i32 = arith.constant 0 : i32
    %c0_i32_0 = arith.constant 0 : i32
    %c0_i32_1 = arith.constant 0 : i32
    return %arg0, %c0_i32, %c0_i32_0 : i32, i32, i32
  }
  func.func @transform_1(%arg0: i32) -> (i32, i32, i32) {
    %c0_i32 = arith.constant 0 : i32
    %c0_i32_0 = arith.constant 0 : i32
    %c0_i32_1 = arith.constant 0 : i32
    return %arg0, %c0_i32, %c0_i32_0 : i32, i32, i32
  }
}

</mosaic_0001>

<bundles_post_ra>
// kernel: tpu_custom_call.1
= control target key start
LH: loop header
LB: loop body
LE: loop exit
PB: predicated region body
PF: predicated region fallthrough
CT: control target
= control target key end

     0   :  { %6 = vsyncpa [#allocation3], 0  ;;  %s3024_s0 = inlined_call_operand.hbm [shape: f32[8,16,16], index: 0, kind: input, shape index: {}]   ;;  %s3025_s1 = inlined_call_operand.hbm [shape: f32[8,32,32], index: 1, kind: output, shape index: {}]  }
   0x1   :  { %7 = vsyncpa [#allocation4], 0  ;;  %s12_s8 = sshll.u32 %s3024_s0, 4  ;;  %s1748_s9 = smov [#allocation2]   ;;  %s13_s8 = int_to_ptr.hbm [resolvable:$true] %s12_s8 }
   0x2   :  { %s14_s10 = sshll.u32 %s1748_s9, 4  ;;  %s1749_s11 = smov 128   ;;  %s15_s10 = int_to_ptr.vmem [resolvable:$true] %s14_s10 }
   0x3   :  { %s1750_s12 = smov 8  }
   0x4   :  { %20 = dma.hbm_to_vmem [thread:$0]  %s13_s8, 2048, %s15_s10, [#allocation3], %s1749_s11, %s1749_s11, %s1750_s12  }
   0x5   :  { %1744 = dma.done.wait [#allocation3], 2048  }
   0x6   :  { %1745 = vsyncadd [#allocation3], 4294965248  ;;  %v1751_v0 = vmov 0   ;;  %v1784_v1 = vld [vmem:[#allocation2 + $0x20] sm:$0xff]  ;;  %v1786_v2 = vld [vmem:[#allocation2 + $0x10] sm:$0xff]  ;;  %v1752_v17 = vmov 1  }
   0x7   :  { %1634 = vset.pattern.permute.xlu2 %v1751_v0  ;;  %1633 = vset.pattern.permute.xlu1 %v1751_v0  ;;  %v1788_v3 = vld [vmem:[#allocation2] sm:$0xff]  ;;  %v1793_v4 = vld [vmem:[#allocation2 + $0x28] sm:$0xff]  ;;  %v1795_v5 = vld [vmem:[#allocation2 + $0x18] sm:$0xff]  ;;  %v1753_v18 = vmov 2   ;;  %v1754_v27 = vmov 3   ;;  %v1755_v43 = vmov 4  }
   0x8   :  { %1632 = vset.pattern.permute.xlu0 %v1751_v0  ;;  %63 = vperm.xlu2 %1634, %v1784_v1   ;;  %v1797_v6 = vld [vmem:[#allocation2 + $0x8] sm:$0xff]  ;;  %v1802_v7 = vld [vmem:[#allocation2 + $0x40] sm:$0xff]  ;;  %v1804_v8 = vld [vmem:[#allocation2 + $0x38] sm:$0xff]  ;;  %v1756_v56 = vmov 5   ;;  %vm1081_vm0 = vcmask 15360   ;;  %vm1098_vm1 = vcmask 31744  }
   0x9   :  { %53 = vperm.xlu1 %1633, %v1786_v2   ;;  %43 = vperm.xlu0 %1632, %v1788_v3   ;;  %v1806_v9 = vld [vmem:[#allocation2 + $0x30] sm:$0xff]  ;;  %v1811_v10 = vld [vmem:[#allocation2 + $0x58] sm:$0xff]  ;;  %v1815_v12 = vld [vmem:[#allocation2 + $0x48] sm:$0xff]  ;;  %vm1115_vm2 = vcmask 48128   ;;  %vm1132_vm3 = vcmask 64512   ;;  %vm1149_vm4 = vcmask 80896  }
   0xa   :  { %v1813_v11 = vld [vmem:[#allocation2 + $0x50] sm:$0xff]  ;;  %3032 = vst [vmem:[#allocation8_spill] sm:$0xff] %v1815_v12  ;;  %v1822_v14 = vld [vmem:[#allocation2 + $0x68] sm:$0xff]  ;;  %v1824_v15 = vld [vmem:[#allocation2 + $0x60] sm:$0xff]  ;;  %vm1166_vm5 = vcmask 97280   ;;  %vm1183_vm6 = vcmask 113664  }
   0xb   :  { %v1820_v13 = vld [vmem:[#allocation2 + $0x70] sm:$0xff]  ;;  %3033 = vst [vmem:[#allocation9_spill] sm:$0xff] %v1824_v15  ;;  %v1829_v16 = vld [vmem:[#allocation2 + $0x78] sm:$0xff]  ;;  %vm1200_vm7 = vcmask 130048   ;;  %vm1217_vm8 = vcmask 146432   ;;  %vm1234_vm9 = vcmask 162816  }
   0xc   :  { %vm1251_vm10 = vcmask 179200   ;;  %vm1268_vm11 = vcmask 195584   ;;  %vm1285_vm12 = vcmask 211968   ;;  %vm1302_vm13 = vcmask 228352   ;;  %s1767_s0 = smov [#allocation5]   ;;  %s1599_s16 = sshll.u32 %s3025_s1, 4  ;;  %s1600_s16 = int_to_ptr.hbm [resolvable:$true] %s1599_s16 }
   0xd   :  { %vm1319_vm14 = vcmask 244736   ;;  %vm1344_vm15 = vcmask 254976   ;;  %s1597_s13 = sshll.u32 %s1767_s0, 4  ;;  %s1598_s13 = int_to_ptr.vmem [resolvable:$true] %s1597_s13 }
  0x10   :  { %68 = vperm.xlu2 %1634, %v1793_v4  }
  0x11   :  { %58 = vperm.xlu1 %1633, %v1795_v5   ;;  %48 = vperm.xlu0 %1632, %v1797_v6  }
  0x18   :  { %83 = vperm.xlu2 %1634, %v1802_v7  }
  0x19   :  { %78 = vperm.xlu1 %1633, %v1804_v8   ;;  %73 = vperm.xlu0 %1632, %v1806_v9  }
  0x20   :  { %98 = vperm.xlu2 %1634, %v1811_v10  }
  0x21   :  { %93 = vperm.xlu1 %1633, %v1813_v11   ;;  %88 = vperm.xlu0 %1632, %v1815_v12  }
  0x28   :  { %113 = vperm.xlu2 %1634, %v1820_v13  }
  0x29   :  { %108 = vperm.xlu1 %1633, %v1822_v14   ;;  %103 = vperm.xlu0 %1632, %v1824_v15  }
  0x30   :  { %1636 = vset.pattern.permute.xlu2 %v1752_v17 }
  0x31   :  { %1635 = vset.pattern.permute.xlu1 %v1752_v17  ;;  %118 = vperm.xlu0 %1632, %v1829_v16  }
  0x32   :  { %126 = vperm.xlu2 %1636, %v1797_v6   ;;  %122 = vperm.xlu1 %1635, %v1788_v3  }
  0x39   :  { %1637 = vset.pattern.permute.xlu0 %v1752_v17 }
  0x3a   :  { %138 = vperm.xlu2 %1636, %v1784_v1   ;;  %134 = vperm.xlu1 %1635, %v1795_v5  }
  0x3b   :  { %130 = vperm.xlu0 %1637, %v1786_v2  }
  0x42   :  { %146 = vperm.xlu2 %1636, %v1806_v9   ;;  %142 = vperm.xlu1 %1635, %v1793_v4  }
  0x43   :  { %150 = vperm.xlu0 %1637, %v1804_v8  }
  0x4a   :  { %158 = vperm.xlu2 %1636, %v1815_v12   ;;  %154 = vperm.xlu1 %1635, %v1802_v7  }
  0x4b   :  { %162 = vperm.xlu0 %1637, %v1813_v11  }
  0x52   :  { %170 = vperm.xlu2 %1636, %v1824_v15   ;;  %166 = vperm.xlu1 %1635, %v1811_v10  }
  0x53   :  { %174 = vperm.xlu0 %1637, %v1822_v14  }
  0x5a   :  { %182 = vperm.xlu2 %1636, %v1829_v16   ;;  %178 = vperm.xlu1 %1635, %v1820_v13  }
  0x5b   :  { %1638 = vset.pattern.permute.xlu0 %v1753_v18 }
  0x5c   :  { %186 = vperm.xlu0 %1638, %v1788_v3  }
  0x62   :  { %1640 = vset.pattern.permute.xlu2 %v1753_v18  ;;  %1639 = vset.pattern.permute.xlu1 %v1753_v18  ;;  %v1849_v19 = vpop.permute.xlu2 %63 }
  0x63   :  { %194 = vperm.xlu2 %1640, %v1786_v2   ;;  %190 = vperm.xlu1 %1639, %v1797_v6  }
  0x64   :  { %206 = vperm.xlu0 %1638, %v1793_v4  }
  0x6a   :  { %v1854_v20 = vpop.permute.xlu2 %68 }
  0x6b   :  { %3034 = vst [vmem:[#allocation10_spill] sm:$0xff] %v1854_v20  ;;  %202 = vperm.xlu2 %1640, %v1784_v1   ;;  %198 = vperm.xlu1 %1639, %v1795_v5  }
  0x6c   :  { %218 = vperm.xlu0 %1638, %v1802_v7  }
  0x72   :  { %v1859_v21 = vpop.permute.xlu2 %83 }
  0x73   :  { %3035 = vst [vmem:[#allocation11_spill] sm:$0xff] %v1859_v21  ;;  %214 = vperm.xlu2 %1640, %v1804_v8   ;;  %210 = vperm.xlu1 %1639, %v1806_v9  }
  0x74   :  { %230 = vperm.xlu0 %1638, %v1811_v10  }
  0x7a   :  { %v1864_v22 = vpop.permute.xlu2 %98 }
  0x7b   :  { %v1866_v23 = vpop.permute.xlu1 %53  ;;  %226 = vperm.xlu2 %1640, %v1813_v11   ;;  %222 = vperm.xlu1 %1639, %v1815_v12   ;;  %v1871_v24 = vpop.permute.xlu0 %43 }
  0x7c   :  { %242 = vperm.xlu0 %1638, %v1820_v13   ;;  %3036 = vst [vmem:[#allocation12_spill] sm:$0xff] %v1871_v24 }
  0x82   :  { %v1873_v25 = vpop.permute.xlu2 %113 }
  0x83   :  { %v1875_v26 = vpop.permute.xlu1 %58  ;;  %238 = vperm.xlu2 %1640, %v1822_v14   ;;  %234 = vperm.xlu1 %1639, %v1824_v15   ;;  %v1879_v28 = vpop.permute.xlu0 %48 }
  0x84   :  { %3037 = vst [vmem:[#allocation13_spill] sm:$0xff] %v1875_v26  ;;  %1642 = vset.pattern.permute.xlu0 %v1754_v27 }
  0x85   :  { %3038 = vst [vmem:[#allocation14_spill] sm:$0xff] %v1879_v28  ;;  %254 = vperm.xlu0 %1642, %v1797_v6  }
  0x8b   :  { %v1882_v29 = vpop.permute.xlu1 %78  ;;  %1641 = vset.pattern.permute.xlu2 %v1754_v27  ;;  %246 = vperm.xlu1 %1639, %v1829_v16   ;;  %v1888_v31 = vpop.permute.xlu0 %73 }
  0x8c   :  { %v1885_v30 = vpop.permute.xlu2 %126  ;;  %250 = vperm.xlu2 %1641, %v1788_v3  }
  0x8d   :  { %3039 = vst [vmem:[#allocation15_spill] sm:$0xff] %v1885_v30  ;;  %274 = vperm.xlu0 %1642, %v1806_v9  }
  0x93   :  { %v1891_v32 = vpop.permute.xlu1 %93  ;;  %1643 = vset.pattern.permute.xlu1 %v1754_v27  ;;  %v1896_v34 = vpop.permute.xlu0 %88 }
  0x94   :  { %v1893_v33 = vpop.permute.xlu2 %138  ;;  %262 = vperm.xlu2 %1641, %v1795_v5   ;;  %258 = vperm.xlu1 %1643, %v1786_v2  }
  0x95   :  { %286 = vperm.xlu0 %1642, %v1815_v12  }
  0x9b   :  { %v1900_v35 = vpop.permute.xlu1 %108  ;;  %v1905_v37 = vpop.permute.xlu0 %103 }
  0x9c   :  { %v1902_v36 = vpop.permute.xlu2 %146  ;;  %270 = vperm.xlu2 %1641, %v1793_v4   ;;  %266 = vperm.xlu1 %1643, %v1784_v1  }
  0x9d   :  { %298 = vperm.xlu0 %1642, %v1824_v15  }
  0xa3   :  { %v1912_v39 = vpop.permute.xlu0 %118 }
  0xa4   :  { %v1909_v38 = vpop.permute.xlu2 %158  ;;  %282 = vperm.xlu2 %1641, %v1802_v7   ;;  %278 = vperm.xlu1 %1643, %v1804_v8   ;;  %v1915_v40 = vpop.permute.xlu1 %122 }
  0xa5   :  { %3040 = vst [vmem:[#allocation16_spill] sm:$0xff] %v1915_v40  ;;  %310 = vperm.xlu0 %1642, %v1829_v16  }
  0xac   :  { %v1918_v41 = vpop.permute.xlu2 %170  ;;  %294 = vperm.xlu2 %1641, %v1811_v10   ;;  %290 = vperm.xlu1 %1643, %v1813_v11   ;;  %v1922_v42 = vpop.permute.xlu1 %134 }
  0xad   :  { %3041 = vst [vmem:[#allocation17_spill] sm:$0xff] %v1922_v42  ;;  %1646 = vset.pattern.permute.xlu0 %v1755_v43  ;;  %v1924_v44 = vpop.permute.xlu0 %130 }
  0xae   :  { %322 = vperm.xlu0 %1646, %v1786_v2  }
  0xb4   :  { %v1927_v45 = vpop.permute.xlu2 %182  ;;  %306 = vperm.xlu2 %1641, %v1820_v13   ;;  %302 = vperm.xlu1 %1643, %v1822_v14   ;;  %v1931_v46 = vpop.permute.xlu1 %142 }
  0xb5   :  { %3042 = vst [vmem:[#allocation18_spill] sm:$0xff] %v1931_v46  ;;  %v1933_v47 = vpop.permute.xlu0 %150 }
  0xb6   :  { %342 = vperm.xlu0 %1646, %v1804_v8  }
  0xbc   :  { %1645 = vset.pattern.permute.xlu2 %v1755_v43  ;;  %1644 = vset.pattern.permute.xlu1 %v1755_v43  ;;  %v1936_v48 = vpop.permute.xlu1 %154 }
  0xbd   :  { %3043 = vst [vmem:[#allocation19_spill] sm:$0xff] %v1936_v48  ;;  %v1938_v49 = vpop.permute.xlu0 %162  ;;  %318 = vperm.xlu2 %1645, %v1797_v6   ;;  %v1941_v50 = vpop.permute.xlu2 %194  ;;  %314 = vperm.xlu1 %1644, %v1788_v3  }
  0xbe   :  { %354 = vperm.xlu0 %1646, %v1813_v11  }
  0xc4   :  { %v1945_v51 = vpop.permute.xlu1 %166 }
  0xc5   :  { %v1947_v52 = vpop.permute.xlu0 %174  ;;  %330 = vperm.xlu2 %1645, %v1784_v1   ;;  %v1950_v53 = vpop.permute.xlu2 %202  ;;  %326 = vperm.xlu1 %1644, %v1795_v5  }
  0xc6   :  { %366 = vperm.xlu0 %1646, %v1822_v14  }
  0xcc   :  { %v1954_v54 = vpop.permute.xlu1 %178 }
  0xcd   :  { %338 = vperm.xlu2 %1645, %v1806_v9   ;;  %v1957_v55 = vpop.permute.xlu2 %214  ;;  %334 = vperm.xlu1 %1644, %v1793_v4  }
  0xce   :  { %1647 = vset.pattern.permute.xlu0 %v1756_v56  ;;  %v1960_v57 = vpop.permute.xlu0 %186 }
  0xcf   :  { %3044 = vst [vmem:[#allocation20_spill] sm:$0xff] %v1960_v57  ;;  %378 = vperm.xlu0 %1647, %v1788_v3  }
  0xd5   :  { %350 = vperm.xlu2 %1645, %v1815_v12   ;;  %v1964_v58 = vpop.permute.xlu2 %226  ;;  %346 = vperm.xlu1 %1644, %v1802_v7   ;;  %v1967_v59 = vpop.permute.xlu1 %190 }
  0xd6   :  { %3045 = vst [vmem:[#allocation21_spill] sm:$0xff] %v1967_v59  ;;  %v1969_v60 = vpop.permute.xlu0 %206 }
  0xd7   :  { %3046 = vst [vmem:[#allocation22_spill] sm:$0xff] %v1969_v60  ;;  %398 = vperm.xlu0 %1647, %v1793_v4   ;;  %v1084_v60 = vsel %vm1081_vm0, %v1866_v23, %v1924_v44  ;;  %v1758_v23 = vmov 7  }
  0xd8   :  { %v1101_v20 = vsel %vm1098_vm1, %v1084_v60, %v1941_v50 }
  0xdd   :  { %362 = vperm.xlu2 %1645, %v1824_v15   ;;  %v1973_v61 = vpop.permute.xlu2 %238  ;;  %358 = vperm.xlu1 %1644, %v1811_v10   ;;  %v1976_v62 = vpop.permute.xlu1 %198 }
  0xde   :  { %3047 = vst [vmem:[#allocation23_spill] sm:$0xff] %v1976_v62  ;;  %v1978_v63 = vpop.permute.xlu0 %218 }
  0xdf   :  { %3048 = vst [vmem:[#allocation24_spill] sm:$0xff] %v1978_v63  ;;  %410 = vperm.xlu0 %1647, %v1802_v7  }
  0xe5   :  { %374 = vperm.xlu2 %1645, %v1829_v16   ;;  %370 = vperm.xlu1 %1644, %v1820_v13   ;;  %v1983_v0 = vpop.permute.xlu1 %210 }
  0xe6   :  { %v1985_v17 = vpop.permute.xlu2 %250  ;;  %v1987_v18 = vpop.permute.xlu0 %230 }
  0xe7   :  { %3049 = vst [vmem:[#allocation25_spill] sm:$0xff] %v1985_v17  ;;  %422 = vperm.xlu0 %1647, %v1811_v10  }
  0xed   :  { %1649 = vset.pattern.permute.xlu2 %v1756_v56  ;;  %1648 = vset.pattern.permute.xlu1 %v1756_v56  ;;  %v1990_v27 = vpop.permute.xlu1 %222  ;;  %v1757_v56 = vmov 6  }
  0xee   :  { %386 = vperm.xlu2 %1649, %v1786_v2   ;;  %v1993_v43 = vpop.permute.xlu2 %262  ;;  %v1995_v62 = vpop.permute.xlu0 %242  ;;  %382 = vperm.xlu1 %1648, %v1797_v6  }
  0xef   :  { %3050 = vst [vmem:[#allocation26_spill] sm:$0xff] %v1993_v43  ;;  %434 = vperm.xlu0 %1647, %v1820_v13  }
  0xf5   :  { %v1999_v26 = vpop.permute.xlu1 %234 }
  0xf6   :  { %3051 = vst [vmem:[#allocation27_spill] sm:$0xff] %v1999_v26  ;;  %394 = vperm.xlu2 %1649, %v1784_v1   ;;  %v2002_v42 = vpop.permute.xlu2 %270  ;;  %390 = vperm.xlu1 %1648, %v1795_v5  }
  0xf7   :  { %3052 = vst [vmem:[#allocation28_spill] sm:$0xff] %v2002_v42  ;;  %1651 = vset.pattern.permute.xlu0 %v1757_v56  ;;  %v2005_v17 = vpop.permute.xlu0 %254  ;;  %v1086_v42 = vsel %vm1081_vm0, %v1849_v19, %v1893_v33 }
  0xf8   :  { %3053 = vst [vmem:[#allocation29_spill] sm:$0xff] %v2005_v17  ;;  %446 = vperm.xlu0 %1651, %v1797_v6   ;;  %v1103_v46 = vsel %vm1098_vm1, %v1086_v42, %v1950_v53 }
  0xfd   :  { %v2008_v43 = vpop.permute.xlu1 %246 }
  0xfe   :  { %406 = vperm.xlu2 %1649, %v1804_v8   ;;  %v2011_v57 = vpop.permute.xlu2 %282  ;;  %402 = vperm.xlu1 %1648, %v1806_v9  }
  0xff   :  { %3054 = vst [vmem:[#allocation30_spill] sm:$0xff] %v2011_v57  ;;  %v2014_v24 = vpop.permute.xlu0 %274 }
 0x100   :  { %466 = vperm.xlu0 %1651, %v1806_v9  }
 0x106   :  { %418 = vperm.xlu2 %1649, %v1813_v11   ;;  %v2018_v40 = vpop.permute.xlu2 %294  ;;  %414 = vperm.xlu1 %1648, %v1815_v12   ;;  %v259_v17 = vpop.permute.xlu1 %258 }
 0x107   :  { %v2021_v59 = vpop.permute.xlu0 %286 }
 0x108   :  { %478 = vperm.xlu0 %1651, %v1815_v12  }
 0x10e   :  { %430 = vperm.xlu2 %1649, %v1822_v14   ;;  %v2025_v28 = vpop.permute.xlu2 %306  ;;  %426 = vperm.xlu1 %1648, %v1824_v15   ;;  %v267_v30 = vpop.permute.xlu1 %266 }
 0x10f   :  { %v2028_v57 = vpop.permute.xlu0 %298  ;;  %v1120_v26 = vsel %vm1115_vm2, %v1103_v46, %v267_v30 }
 0x110   :  { %3055 = vst [vmem:[#allocation31_spill] sm:$0xff] %v2028_v57  ;;  %490 = vperm.xlu0 %1651, %v1824_v15   ;;  %v1118_v57 = vsel %vm1115_vm2, %v1101_v20, %v259_v17  ;;  %v1089_v20 = vsel %vm1081_vm0, %v1882_v29, %v1933_v47  ;;  %v1092_v29 = vsel %vm1081_vm0, %v1891_v32, %v1938_v49 }
 0x111   :  { %v1106_v30 = vsel %vm1098_vm1, %v1089_v20, %v1957_v55  ;;  %v1109_v47 = vsel %vm1098_vm1, %v1092_v29, %v1964_v58  ;;  %v1095_v32 = vsel %vm1081_vm0, %v1900_v35, %v1947_v52  ;;  %v1097_v35 = vsel %vm1081_vm0, %v1912_v39, %v1927_v45 }
 0x112   :  { %v1112_v49 = vsel %vm1098_vm1, %v1095_v32, %v1973_v61  ;;  %v1114_v52 = vsel %vm1098_vm1, %v1097_v35, %v2008_v43  ;;  %v1759_v29 = vmov 8   ;;  %v1093_v43 = vsel %vm1081_vm0, %v1864_v22, %v1945_v51 }
 0x113   :  { %v1096_v22 = vsel %vm1081_vm0, %v1873_v25, %v1954_v54 }
 0x116   :  { %1650 = vset.pattern.permute.xlu2 %v1757_v56  ;;  %438 = vperm.xlu1 %1648, %v1829_v16   ;;  %v279_v63 = vpop.permute.xlu1 %278 }
 0x117   :  { %v311_v21 = vpop.permute.xlu0 %310  ;;  %442 = vperm.xlu2 %1650, %v1788_v3   ;;  %v2033_v48 = vpop.permute.xlu2 %318  ;;  %v1123_v50 = vsel %vm1115_vm2, %v1106_v30, %v279_v63 }
 0x118   :  { %3056 = vst [vmem:[#allocation32_spill] sm:$0xff] %v2033_v48  ;;  %502 = vperm.xlu0 %1651, %v1829_v16   ;;  %v1131_v61 = vsel %vm1115_vm2, %v1114_v52, %v311_v21 }
 0x11e   :  { %1652 = vset.pattern.permute.xlu1 %v1757_v56  ;;  %v291_v48 = vpop.permute.xlu1 %290 }
 0x11f   :  { %454 = vperm.xlu2 %1650, %v1795_v5   ;;  %v331_v19 = vpop.permute.xlu2 %330  ;;  %450 = vperm.xlu1 %1652, %v1786_v2   ;;  %v1126_v63 = vsel %vm1115_vm2, %v1109_v47, %v291_v48  ;;  %v1110_v47 = vsel %vm1098_vm1, %v1093_v43, %v1987_v18 }
 0x120   :  { %1655 = vset.pattern.permute.xlu0 %v1758_v23  ;;  %v323_v33 = vpop.permute.xlu0 %322  ;;  %v2051_v44 = vsel %vm1132_vm3, %v1120_v26, %v331_v19 }
 0x121   :  { %v2054_v42 = vsel %vm1132_vm3, %v1118_v57, %v323_v33  ;;  %514 = vperm.xlu0 %1655, %v1786_v2  }
 0x126   :  { %v303_v46 = vpop.permute.xlu1 %302 }
 0x127   :  { %462 = vperm.xlu2 %1650, %v1793_v4   ;;  %v2064_v53 = vpop.permute.xlu2 %338  ;;  %458 = vperm.xlu1 %1652, %v1784_v1   ;;  %v1129_v19 = vsel %vm1115_vm2, %v1112_v49, %v303_v46 }
 0x128   :  { %v343_v26 = vpop.permute.xlu0 %342 }
 0x129   :  { %v2068_v57 = vsel %vm1132_vm3, %v1123_v50, %v343_v26  ;;  %534 = vperm.xlu0 %1655, %v1804_v8  }
 0x12f   :  { %474 = vperm.xlu2 %1650, %v1802_v7   ;;  %v2077_v55 = vpop.permute.xlu2 %350  ;;  %470 = vperm.xlu1 %1652, %v1804_v8   ;;  %v2080_v60 = vpop.permute.xlu1 %314 }
 0x130   :  { %3057 = vst [vmem:[#allocation33_spill] sm:$0xff] %v2080_v60  ;;  %v355_v17 = vpop.permute.xlu0 %354 }
 0x131   :  { %546 = vperm.xlu0 %1655, %v1813_v11   ;;  %v2085_v56 = vsel %vm1132_vm3, %v1126_v63, %v355_v17 }
 0x137   :  { %486 = vperm.xlu2 %1650, %v1811_v10   ;;  %v2093_v58 = vpop.permute.xlu2 %362  ;;  %482 = vperm.xlu1 %1652, %v1813_v11   ;;  %v2096_v48 = vpop.permute.xlu1 %326 }
 0x138   :  { %3058 = vst [vmem:[#allocation34_spill] sm:$0xff] %v2096_v48  ;;  %v367_v33 = vpop.permute.xlu0 %366 }
 0x139   :  { %558 = vperm.xlu0 %1655, %v1822_v14   ;;  %v2101_v20 = vsel %vm1132_vm3, %v1129_v19, %v367_v33 }
 0x13f   :  { %498 = vperm.xlu2 %1650, %v1820_v13   ;;  %v375_v30 = vpop.permute.xlu2 %374  ;;  %494 = vperm.xlu1 %1652, %v1822_v14   ;;  %v2111_v46 = vpop.permute.xlu1 %334 }
 0x140   :  { %v2114_v50 = vsel %vm1132_vm3, %v1131_v61, %v375_v30 }
 0x141   :  { %v2116_v26 = vpop.permute.xlu0 %378  ;;  %1656 = vset.pattern.permute.xlu0 %v1759_v29 }
 0x142   :  { %3059 = vst [vmem:[#allocation35_spill] sm:$0xff] %v2116_v26  ;;  %570 = vperm.xlu0 %1656, %v1788_v3  }
 0x147   :  { %1654 = vset.pattern.permute.xlu2 %v1758_v23  ;;  %1653 = vset.pattern.permute.xlu1 %v1758_v23  ;;  %v2119_v39 = vpop.permute.xlu1 %346  ;;  %v1127_v23 = vsel %vm1115_vm2, %v1110_v47, %v2018_v40  ;;  %v1113_v40 = vsel %vm1098_vm1, %v1096_v22, %v1995_v62  ;;  %v1760_v47 = vmov 9  }
 0x148   :  { %510 = vperm.xlu2 %1654, %v1797_v6   ;;  %v2122_v21 = vpop.permute.xlu2 %386  ;;  %506 = vperm.xlu1 %1653, %v1788_v3   ;;  %v1130_v51 = vsel %vm1115_vm2, %v1113_v40, %v2025_v28 }
 0x149   :  { %v2125_v45 = vpop.permute.xlu0 %398  ;;  %v1152_v26 = vsel %vm1149_vm4, %v2054_v42, %v2122_v21 }
 0x14a   :  { %590 = vperm.xlu0 %1656, %v1793_v4  }
 0x14f   :  { %v359_v63 = vpop.permute.xlu1 %358 }
 0x150   :  { %522 = vperm.xlu2 %1654, %v1784_v1   ;;  %v2136_v17 = vpop.permute.xlu2 %394  ;;  %v1144_v32 = vsel %vm1132_vm3, %v1127_v23, %v359_v63  ;;  %518 = vperm.xlu1 %1653, %v1795_v5  }
 0x151   :  { %v2140_v49 = vpop.permute.xlu0 %410 }
 0x152   :  { %602 = vperm.xlu0 %1656, %v1802_v7  }
 0x157   :  { %v371_v18 = vpop.permute.xlu1 %370 }
 0x158   :  { %530 = vperm.xlu2 %1654, %v1806_v9   ;;  %v2151_v19 = vpop.permute.xlu2 %406  ;;  %v1147_v33 = vsel %vm1132_vm3, %v1130_v51, %v371_v18  ;;  %526 = vperm.xlu1 %1653, %v1793_v4  }
 0x159   :  { %v423_v35 = vpop.permute.xlu0 %422  ;;  %v1157_v21 = vsel %vm1149_vm4, %v2068_v57, %v2151_v19 }
 0x15a   :  { %v2156_v52 = vsel %vm1149_vm4, %v1144_v32, %v423_v35  ;;  %614 = vperm.xlu0 %1656, %v1811_v10  }
 0x160   :  { %542 = vperm.xlu2 %1654, %v1815_v12   ;;  %v2160_v25 = vpop.permute.xlu2 %418  ;;  %538 = vperm.xlu1 %1653, %v1802_v7   ;;  %v2163_v28 = vpop.permute.xlu1 %382 }
 0x161   :  { %v435_v54 = vpop.permute.xlu0 %434 }
 0x162   :  { %v2166_v62 = vsel %vm1149_vm4, %v1147_v33, %v435_v54  ;;  %626 = vperm.xlu0 %1656, %v1820_v13  }
 0x168   :  { %554 = vperm.xlu2 %1654, %v1824_v15   ;;  %v2170_v61 = vpop.permute.xlu2 %430  ;;  %550 = vperm.xlu1 %1653, %v1811_v10   ;;  %v2173_v30 = vpop.permute.xlu1 %390 }
 0x169   :  { %3060 = vst [vmem:[#allocation36_spill] sm:$0xff] %v2173_v30 }
 0x16a   :  { %v2175_v43 = vpop.permute.xlu0 %446  ;;  %1660 = vset.pattern.permute.xlu0 %v1760_v47 }
 0x16b   :  { %3061 = vst [vmem:[#allocation37_spill] sm:$0xff] %v2175_v43  ;;  %638 = vperm.xlu0 %1660, %v1797_v6   ;;  %v3026_v43 = vmov 10  }
 0x170   :  { %566 = vperm.xlu2 %1654, %v1829_v16   ;;  %562 = vperm.xlu1 %1653, %v1820_v13   ;;  %v2180_v23 = vpop.permute.xlu1 %402 }
 0x171   :  { %v2182_v63 = vpop.permute.xlu2 %442 }
 0x172   :  { %3062 = vst [vmem:[#allocation38_spill] sm:$0xff] %v2182_v63  ;;  %v2184_v32 = vpop.permute.xlu0 %466 }
 0x173   :  { %658 = vperm.xlu0 %1660, %v1806_v9  }
 0x178   :  { %1658 = vset.pattern.permute.xlu2 %v1759_v29  ;;  %1657 = vset.pattern.permute.xlu1 %v1759_v29  ;;  %v2187_v22 = vpop.permute.xlu1 %414 }
 0x179   :  { %578 = vperm.xlu2 %1658, %v1786_v2   ;;  %v2190_v40 = vpop.permute.xlu2 %454  ;;  %574 = vperm.xlu1 %1657, %v1797_v6  }
 0x17a   :  { %3063 = vst [vmem:[#allocation39_spill] sm:$0xff] %v2190_v40  ;;  %v2193_v51 = vpop.permute.xlu0 %478 }
 0x17b   :  { %670 = vperm.xlu0 %1660, %v1815_v12  }
 0x180   :  { %v2196_v18 = vpop.permute.xlu1 %426 }
 0x181   :  { %586 = vperm.xlu2 %1658, %v1784_v1   ;;  %v2199_v33 = vpop.permute.xlu2 %462  ;;  %582 = vperm.xlu1 %1657, %v1795_v5  }
 0x182   :  { %v2202_v29 = vpop.permute.xlu0 %490 }
 0x183   :  { %682 = vperm.xlu0 %1660, %v1824_v15  }
 0x188   :  { %v439_v35 = vpop.permute.xlu1 %438 }
 0x189   :  { %598 = vperm.xlu2 %1658, %v1804_v8   ;;  %v2206_v54 = vpop.permute.xlu2 %474  ;;  %v1165_v40 = vsel %vm1149_vm4, %v2114_v50, %v439_v35  ;;  %594 = vperm.xlu1 %1657, %v1806_v9  }
 0x18a   :  { %v503_v30 = vpop.permute.xlu0 %502 }
 0x18b   :  { %v2212_v48 = vsel %vm1166_vm5, %v1165_v40, %v503_v30  ;;  %694 = vperm.xlu0 %1660, %v1829_v16  }
 0x191   :  { %610 = vperm.xlu2 %1658, %v1813_v11   ;;  %v2216_v63 = vpop.permute.xlu2 %486  ;;  %606 = vperm.xlu1 %1657, %v1815_v12   ;;  %v451_v50 = vpop.permute.xlu1 %450  ;;  %v1160_v12 = vsel %vm1149_vm4, %v2085_v56, %v2160_v25 }
 0x192   :  { %v1169_v35 = vsel %vm1166_vm5, %v1152_v26, %v451_v50 }
 0x193   :  { %v515_v60 = vpop.permute.xlu0 %514  ;;  %1664 = vset.pattern.permute.xlu0 %v3026_v43 }
 0x194   :  { %v2225_v30 = vsel %vm1183_vm6, %v1169_v35, %v515_v60  ;;  %706 = vperm.xlu0 %1664, %v1786_v2  }
 0x199   :  { %622 = vperm.xlu2 %1658, %v1822_v14   ;;  %v2229_v40 = vpop.permute.xlu2 %498  ;;  %618 = vperm.xlu1 %1657, %v1824_v15   ;;  %v2232_v42 = vpop.permute.xlu1 %458 }
 0x19b   :  { %v535_v26 = vpop.permute.xlu0 %534 }
 0x19c   :  { %726 = vperm.xlu0 %1664, %v1804_v8  }
 0x1a1   :  { %1659 = vset.pattern.permute.xlu2 %v1760_v47  ;;  %630 = vperm.xlu1 %1657, %v1829_v16   ;;  %v471_v60 = vpop.permute.xlu1 %470 }
 0x1a2   :  { %634 = vperm.xlu2 %1659, %v1788_v3   ;;  %v2240_v50 = vpop.permute.xlu2 %510  ;;  %v1174_v35 = vsel %vm1166_vm5, %v1157_v21, %v471_v60  ;;  %v1088_v21 = vsel %vm1081_vm0, %v1888_v31, %v1902_v36 }
 0x1a3   :  { %v2244_v43 = vsel %vm1183_vm6, %v1174_v35, %v535_v26  ;;  %v547_v15 = vpop.permute.xlu0 %546  ;;  %v1105_v60 = vsel %vm1098_vm1, %v1088_v21, %v1983_v0 }
 0x1a4   :  { %738 = vperm.xlu0 %1664, %v1813_v11   ;;  %v1122_v56 = vsel %vm1115_vm2, %v1105_v60, %v2014_v24  ;;  %v1091_v24 = vsel %vm1081_vm0, %v1896_v34, %v1909_v38 }
 0x1a5   :  { %v1139_v25 = vsel %vm1132_vm3, %v1122_v56, %v2064_v53 }
 0x1a6   :  { %v1156_v31 = vsel %vm1149_vm4, %v1139_v25, %v2180_v23 }
 0x1a9   :  { %1661 = vset.pattern.permute.xlu1 %v1760_v47  ;;  %v483_v57 = vpop.permute.xlu1 %482 }
 0x1aa   :  { %646 = vperm.xlu2 %1659, %v1795_v5   ;;  %v2251_v19 = vpop.permute.xlu2 %522  ;;  %v1177_v26 = vsel %vm1166_vm5, %v1160_v12, %v483_v57  ;;  %642 = vperm.xlu1 %1661, %v1786_v2   ;;  %v1163_v2 = vsel %vm1149_vm4, %v2101_v20, %v2170_v61  ;;  %v1108_v20 = vsel %vm1098_vm1, %v1091_v24, %v1990_v27 }
 0x1ab   :  { %v2261_v35 = vsel %vm1183_vm6, %v1177_v26, %v547_v15  ;;  %v559_v12 = vpop.permute.xlu0 %558  ;;  %v1173_v15 = vsel %vm1166_vm5, %v1156_v31, %v2184_v32  ;;  %v1125_v23 = vsel %vm1115_vm2, %v1108_v20, %v2021_v59  ;;  %v1762_v32 = vmov 11  }
 0x1ac   :  { %750 = vperm.xlu0 %1664, %v1822_v14   ;;  %v1142_v34 = vsel %vm1132_vm3, %v1125_v23, %v2077_v55  ;;  %v1094_v59 = vsel %vm1081_vm0, %v1905_v37, %v1918_v41 }
 0x1ad   :  { %v1159_v38 = vsel %vm1149_vm4, %v1142_v34, %v2187_v22  ;;  %v3064_v22 = vld [vmem:[#allocation27_spill] sm:$0xff] }
 0x1ae   :  { %v1176_v27 = vsel %vm1166_vm5, %v1159_v38, %v2193_v51  ;;  %v1111_v60 = vsel %vm1098_vm1, %v1094_v59, %v3064_v22  ;;  %v3065_v51 = vld [vmem:[#allocation31_spill] sm:$0xff] }
 0x1af   :  { %v1128_v56 = vsel %vm1115_vm2, %v1111_v60, %v3065_v51  ;;  %v3071_v59 = vld [vmem:[#allocation11_spill] sm:$0xff]  ;;  %v3073_v60 = vld [vmem:[#allocation30_spill] sm:$0xff] }
 0x1b0   :  { %v1145_v25 = vsel %vm1132_vm3, %v1128_v56, %v2093_v58  ;;  %v3066_v58 = vld [vmem:[#allocation18_spill] sm:$0xff] }
 0x1b1   :  { %v495_v36 = vpop.permute.xlu1 %494  ;;  %v1162_v37 = vsel %vm1149_vm4, %v1145_v25, %v2196_v18  ;;  %v3068_v18 = vld [vmem:[#allocation22_spill] sm:$0xff]  ;;  %v3074_v25 = vmov 10  }
 0x1b2   :  { %654 = vperm.xlu2 %1659, %v1793_v4   ;;  %v531_v0 = vpop.permute.xlu2 %530  ;;  %v1180_v53 = vsel %vm1166_vm5, %v1163_v2, %v495_v36  ;;  %650 = vperm.xlu1 %1661, %v1784_v1  }
 0x1b3   :  { %v2281_v47 = vsel %vm1183_vm6, %v1173_v15, %v531_v0  ;;  %v2287_v61 = vsel %vm1183_vm6, %v1180_v53, %v559_v12  ;;  %v3067_v15 = vld [vmem:[#allocation10_spill] sm:$0xff]  ;;  %v3069_v0 = vld [vmem:[#allocation28_spill] sm:$0xff] }
 0x1b4   :  { %1665 = vset.pattern.permute.xlu0 %v1762_v32  ;;  %v2309_v26 = vpop.permute.xlu0 %570  ;;  %v1087_v36 = vsel %vm1081_vm0, %v3067_v15, %v3066_v58 }
 0x1b5   :  { %762 = vperm.xlu0 %1665, %v1788_v3  }
 0x1ba   :  { %666 = vperm.xlu2 %1659, %v1802_v7   ;;  %v543_v57 = vpop.permute.xlu2 %542  ;;  %662 = vperm.xlu1 %1661, %v1804_v8   ;;  %v2307_v55 = vpop.permute.xlu1 %506  ;;  %v1179_v8 = vsel %vm1166_vm5, %v1162_v37, %v2202_v29  ;;  %v1104_v29 = vsel %vm1098_vm1, %v1087_v36, %v3068_v18 }
 0x1bb   :  { %v2304_v21 = vsel %vm1183_vm6, %v1176_v27, %v543_v57  ;;  %v1121_v24 = vsel %vm1115_vm2, %v1104_v29, %v3069_v0  ;;  %v3070_v57 = vld [vmem:[#allocation19_spill] sm:$0xff] }
 0x1bc   :  { %v591_v2 = vpop.permute.xlu0 %590  ;;  %v1138_v53 = vsel %vm1132_vm3, %v1121_v24, %v2111_v46  ;;  %v1090_v22 = vsel %vm1081_vm0, %v3071_v59, %v3070_v57  ;;  %v3075_v24 = vld [vmem:[#allocation15_spill] sm:$0xff]  ;;  %v3081_v59 = vld [vmem:[#allocation8_spill] sm:$0xff] }
 0x1bd   :  { %782 = vperm.xlu0 %1665, %v1793_v4  }
 0x1c2   :  { %678 = vperm.xlu2 %1659, %v1811_v10   ;;  %v555_v41 = vpop.permute.xlu2 %554  ;;  %674 = vperm.xlu1 %1661, %v1813_v11   ;;  %v2327_v12 = vpop.permute.xlu1 %518  ;;  %v1155_v11 = vsel %vm1149_vm4, %v1138_v53, %v2125_v45  ;;  %v3076_v53 = vld [vmem:[#allocation14_spill] sm:$0xff] }
 0x1c3   :  { %v2324_v31 = vsel %vm1183_vm6, %v1179_v8, %v555_v41  ;;  %v1172_v23 = vsel %vm1166_vm5, %v1155_v11, %v2199_v33  ;;  %v3072_v33 = vld [vmem:[#allocation24_spill] sm:$0xff]  ;;  %v1083_v11 = vsel %vm1081_vm0, %v3076_v53, %v3075_v24 }
 0x1c4   :  { %v603_v45 = vpop.permute.xlu0 %602 }
 0x1c5   :  { %794 = vperm.xlu0 %1665, %v1802_v7  }
 0x1ca   :  { %690 = vperm.xlu2 %1659, %v1820_v13   ;;  %v567_v20 = vpop.permute.xlu2 %566  ;;  %686 = vperm.xlu1 %1661, %v1822_v14   ;;  %v527_v38 = vpop.permute.xlu1 %526 }
 0x1cb   :  { %v2346_v34 = vsel %vm1183_vm6, %v2212_v48, %v567_v20  ;;  %v1189_v27 = vsel %vm1183_vm6, %v1172_v23, %v527_v38  ;;  %v1107_v48 = vsel %vm1098_vm1, %v1090_v22, %v3072_v33  ;;  %v3078_v23 = vld [vmem:[#allocation29_spill] sm:$0xff]  ;;  %v3079_v38 = vld [vmem:[#allocation32_spill] sm:$0xff] }
 0x1cc   :  { %v2351_v46 = vsel %vm1200_vm7, %v1189_v27, %v591_v2  ;;  %v1124_v14 = vsel %vm1115_vm2, %v1107_v48, %v3073_v60 }
 0x1cd   :  { %806 = vperm.xlu0 %1665, %v1811_v10   ;;  %v1141_v51 = vsel %vm1132_vm3, %v1124_v14, %v2119_v39 }
 0x1ce   :  { %v1158_v56 = vsel %vm1149_vm4, %v1141_v51, %v2140_v49  ;;  %v615_v49 = vpop.permute.xlu0 %614  ;;  %v3082_v51 = vld [vmem:[#allocation16_spill] sm:$0xff] }
 0x1cf   :  { %v1175_v37 = vsel %vm1166_vm5, %v1158_v56, %v2206_v54  ;;  %v1154_v54 = vsel %vm1149_vm4, %v2051_v44, %v2136_v17  ;;  %v3083_v56 = vld [vmem:[#allocation12_spill] sm:$0xff] }
 0x1d0   :  { %v1171_v15 = vsel %vm1166_vm5, %v1154_v54, %v2232_v42  ;;  %v3087_v54 = vld [vmem:[#allocation33_spill] sm:$0xff] }
 0x1d2   :  { %1663 = vset.pattern.permute.xlu2 %v3074_v25  ;;  %1662 = vset.pattern.permute.xlu1 %v3074_v25  ;;  %v539_v8 = vpop.permute.xlu1 %538  ;;  %v1082_v25 = vsel %vm1081_vm0, %v3083_v56, %v3082_v51  ;;  %v2508_v51 = vld [vmem:[#allocation2 + $0x20] sm:$0xff] }
 0x1d3   :  { %702 = vperm.xlu2 %1663, %v1797_v6   ;;  %v579_v41 = vpop.permute.xlu2 %578  ;;  %v1192_v2 = vsel %vm1183_vm6, %v1175_v37, %v539_v8  ;;  %698 = vperm.xlu1 %1662, %v1788_v3   ;;  %v1188_v3 = vsel %vm1183_vm6, %v1171_v15, %v2251_v19  ;;  %v3084_v37 = vld [vmem:[#allocation9_spill] sm:$0xff]  ;;  %v3085_v8 = vld [vmem:[#allocation20_spill] sm:$0xff] }
 0x1d4   :  { %v2373_v58 = vsel %vm1200_vm7, %v2225_v30, %v579_v41  ;;  %v2377_v39 = vsel %vm1200_vm7, %v1192_v2, %v603_v45  ;;  %v1178_v30 = vsel %vm1166_vm5, %v2156_v52, %v2216_v63  ;;  %v1181_v52 = vsel %vm1166_vm5, %v2166_v62, %v2229_v40  ;;  %v3077_v40 = vld [vmem:[#allocation21_spill] sm:$0xff] }
 0x1d5   :  { %818 = vperm.xlu0 %1665, %v1820_v13   ;;  %v1763_v62 = vmov 12   ;;  %v1100_v20 = vsel %vm1098_vm1, %v1083_v11, %v3077_v40  ;;  %v3080_v45 = vld [vmem:[#allocation37_spill] sm:$0xff] }
 0x1d6   :  { %v627_v17 = vpop.permute.xlu0 %626 }
 0x1da   :  { %v551_v36 = vpop.permute.xlu1 %550 }
 0x1db   :  { %714 = vperm.xlu2 %1663, %v1784_v1   ;;  %v587_v18 = vpop.permute.xlu2 %586  ;;  %v1195_v29 = vsel %vm1183_vm6, %v1178_v30, %v551_v36  ;;  %710 = vperm.xlu1 %1662, %v1795_v5   ;;  %v3088_v30 = vld [vmem:[#allocation35_spill] sm:$0xff]  ;;  %v3089_v36 = vld [vmem:[#allocation38_spill] sm:$0xff] }
 0x1dc   :  { %v2393_v0 = vsel %vm1200_vm7, %v1188_v3, %v587_v18  ;;  %v2397_v44 = vsel %vm1200_vm7, %v1195_v29, %v615_v49  ;;  %v3086_v49 = vld [vmem:[#allocation25_spill] sm:$0xff] }
 0x1dd   :  { %1669 = vset.pattern.permute.xlu0 %v1763_v62 }
 0x1de   :  { %830 = vperm.xlu0 %1669, %v1797_v6   ;;  %v639_v33 = vpop.permute.xlu0 %638 }
 0x1e2   :  { %v563_v63 = vpop.permute.xlu1 %562 }
 0x1e3   :  { %722 = vperm.xlu2 %1663, %v1806_v9   ;;  %v599_v1 = vpop.permute.xlu2 %598  ;;  %v1198_v42 = vsel %vm1183_vm6, %v1181_v52, %v563_v63  ;;  %718 = vperm.xlu1 %1662, %v1793_v4   ;;  %v3090_v52 = vld [vmem:[#allocation17_spill] sm:$0xff] }
 0x1e4   :  { %v2406_v19 = vsel %vm1200_vm7, %v2244_v43, %v599_v1  ;;  %v2410_v5 = vsel %vm1200_vm7, %v1198_v42, %v627_v17  ;;  %v1117_v43 = vsel %vm1115_vm2, %v1100_v20, %v3078_v23  ;;  %v3091_v63 = vld [vmem:[#allocation13_spill] sm:$0xff]  ;;  %v3094_v20 = vld [vmem:[#allocation34_spill] sm:$0xff] }
 0x1e5   :  { %v1134_v4 = vsel %vm1132_vm3, %v1117_v43, %v3079_v38  ;;  %v1085_v1 = vsel %vm1081_vm0, %v3091_v63, %v3090_v52  ;;  %v3095_v43 = vld [vmem:[#allocation36_spill] sm:$0xff]  ;;  %v3096_v38 = vld [vmem:[#allocation39_spill] sm:$0xff] }
 0x1e6   :  { %v1151_v27 = vsel %vm1149_vm4, %v1134_v4, %v2163_v28  ;;  %850 = vperm.xlu0 %1669, %v1806_v9   ;;  %v659_v2 = vpop.permute.xlu0 %658  ;;  %v2570_v63 = vld [vmem:[#allocation2 + $0x78] sm:$0xff] }
 0x1e7   :  { %v1168_v57 = vsel %vm1166_vm5, %v1151_v27, %v3080_v45 }
 0x1e8   :  { %v1185_v6 = vsel %vm1183_vm6, %v1168_v57, %v2240_v50 }
 0x1eb   :  { %734 = vperm.xlu2 %1663, %v3081_v59   ;;  %v611_v22 = vpop.permute.xlu2 %610  ;;  %730 = vperm.xlu1 %1662, %v1802_v7   ;;  %v575_v60 = vpop.permute.xlu1 %574 }
 0x1ec   :  { %v2432_v48 = vsel %vm1200_vm7, %v2261_v35, %v611_v22  ;;  %v1202_v28 = vsel %vm1200_vm7, %v1185_v6, %v575_v60  ;;  %v1099_v35 = vsel %vm1098_vm1, %v1082_v25, %v3085_v8  ;;  %v2501_v60 = vld [vmem:[#allocation2 + $0x8] sm:$0xff] }
 0x1ed   :  { %v2437_v14 = vsel %vm1217_vm8, %v1202_v28, %v639_v33  ;;  %v1116_v9 = vsel %vm1115_vm2, %v1099_v35, %v3086_v49  ;;  %v2523_v35 = vld [vmem:[#allocation2 + $0x38] sm:$0xff] }
 0x1ee   :  { %v1133_v15 = vsel %vm1132_vm3, %v1116_v9, %v3087_v54  ;;  %862 = vperm.xlu0 %1669, %v3081_v59   ;;  %v2493_v59 = vld [vmem:[#allocation2 + $0x10] sm:$0xff]  ;;  %v1764_v9 = vmov 13  }
 0x1ef   :  { %v1150_v3 = vsel %vm1149_vm4, %v1133_v15, %v3088_v30  ;;  %v2540_v54 = vld [vmem:[#allocation2 + $0x50] sm:$0xff]  ;;  %v2547_v30 = vld [vmem:[#allocation2 + $0x48] sm:$0xff] }
 0x1f0   :  { %v1167_v18 = vsel %vm1166_vm5, %v1150_v3, %v3089_v36 }
 0x1f3   :  { %746 = vperm.xlu2 %1663, %v3084_v37   ;;  %v623_v50 = vpop.permute.xlu2 %622  ;;  %742 = vperm.xlu1 %1662, %v1811_v10   ;;  %v583_v41 = vpop.permute.xlu1 %582 }
 0x1f4   :  { %v2448_v7 = vsel %vm1200_vm7, %v2287_v61, %v623_v50  ;;  %v1184_v61 = vsel %vm1183_vm6, %v1167_v18, %v2307_v55  ;;  %v3092_v55 = vld [vmem:[#allocation23_spill] sm:$0xff] }
 0x1f5   :  { %v1201_v10 = vsel %vm1200_vm7, %v1184_v61, %v2309_v26  ;;  %v1102_v53 = vsel %vm1098_vm1, %v1085_v1, %v3092_v55  ;;  %v671_v26 = vpop.permute.xlu0 %670  ;;  %v2556_v61 = vld [vmem:[#allocation2 + $0x68] sm:$0xff] }
 0x1f6   :  { %874 = vperm.xlu0 %1669, %v3084_v37   ;;  %v2517_v37 = vld [vmem:[#allocation2 + $0x18] sm:$0xff] }
 0x1fb   :  { %758 = vperm.xlu2 %1663, %v1829_v16   ;;  %754 = vperm.xlu1 %1662, %v1820_v13   ;;  %v595_v29 = vpop.permute.xlu1 %594  ;;  %v3093_v13 = vld [vmem:[#allocation26_spill] sm:$0xff] }
 0x1fc   :  { %v635_v17 = vpop.permute.xlu2 %634  ;;  %v1207_v42 = vsel %vm1200_vm7, %v2281_v47, %v595_v29  ;;  %v1119_v40 = vsel %vm1115_vm2, %v1102_v53, %v3093_v13  ;;  %v2563_v29 = vld [vmem:[#allocation2 + $0x60] sm:$0xff] }
 0x1fd   :  { %v2472_v24 = vsel %vm1217_vm8, %v1201_v10, %v635_v17  ;;  %v2477_v11 = vsel %vm1217_vm8, %v1207_v42, %v659_v2  ;;  %v1136_v23 = vsel %vm1132_vm3, %v1119_v40, %v3094_v20  ;;  %v2532_v2 = vld [vmem:[#allocation2 + $0x30] sm:$0xff] }
 0x1fe   :  { %v1153_v47 = vsel %vm1149_vm4, %v1136_v23, %v3095_v43  ;;  %886 = vperm.xlu0 %1669, %v1829_v16  }
 0x1ff   :  { %v1170_v4 = vsel %vm1166_vm5, %v1153_v47, %v3096_v38  ;;  %v2595_v47 = vld [vmem:[#allocation2 + $0x28] sm:$0xff] }
 0x200   :  { %v1187_v27 = vsel %vm1183_vm6, %v1170_v4, %v2327_v12 }
 0x201   :  { %v1204_v45 = vsel %vm1200_vm7, %v1187_v27, %v583_v41  ;;  %v1765_v27 = vmov 14  }
 0x203   :  { %1667 = vset.pattern.permute.xlu2 %v1762_v32  ;;  %1666 = vset.pattern.permute.xlu1 %v1762_v32  ;;  %v607_v57 = vpop.permute.xlu1 %606  ;;  %v683_v32 = vpop.permute.xlu0 %682 }
 0x204   :  { %770 = vperm.xlu2 %1667, %v2493_v59   ;;  %v647_v22 = vpop.permute.xlu2 %646  ;;  %v1210_v33 = vsel %vm1200_vm7, %v2304_v21, %v607_v57  ;;  %766 = vperm.xlu1 %1666, %v2501_v60  }
 0x205   :  { %v2499_v6 = vsel %vm1217_vm8, %v1204_v45, %v647_v22  ;;  %v2505_v12 = vsel %vm1217_vm8, %v1210_v33, %v671_v26  ;;  %v2610_v45 = vld [vmem:[#allocation2 + $0x40] sm:$0xff] }
 0x206   :  { %1673 = vset.pattern.permute.xlu0 %v1764_v9 }
 0x207   :  { %898 = vperm.xlu0 %1673, %v2493_v59  }
 0x20b   :  { %v619_v28 = vpop.permute.xlu1 %618  ;;  %v695_v50 = vpop.permute.xlu0 %694 }
 0x20c   :  { %778 = vperm.xlu2 %1667, %v2508_v51   ;;  %v655_v56 = vpop.permute.xlu2 %654  ;;  %v1213_v21 = vsel %vm1200_vm7, %v2324_v31, %v619_v28  ;;  %774 = vperm.xlu1 %1666, %v2517_v37   ;;  %v2624_v28 = vld [vmem:[#allocation2 + $0x58] sm:$0xff] }
 0x20d   :  { %v2515_v25 = vsel %vm1217_vm8, %v2351_v46, %v655_v56  ;;  %v2521_v16 = vsel %vm1217_vm8, %v1213_v21, %v683_v32 }
 0x20f   :  { %918 = vperm.xlu0 %1673, %v2523_v35  }
 0x213   :  { %v631_v8 = vpop.permute.xlu1 %630 }
 0x214   :  { %790 = vperm.xlu2 %1667, %v2523_v35   ;;  %v667_v41 = vpop.permute.xlu2 %666  ;;  %v1216_v31 = vsel %vm1200_vm7, %v2346_v34, %v631_v8  ;;  %786 = vperm.xlu1 %1666, %v2532_v2   ;;  %v2635_v8 = vld [vmem:[#allocation2 + $0x70] sm:$0xff] }
 0x215   :  { %v2530_v46 = vsel %vm1217_vm8, %v2377_v39, %v667_v41  ;;  %v2536_v49 = vsel %vm1217_vm8, %v1216_v31, %v695_v50  ;;  %v707_v39 = vpop.permute.xlu0 %706 }
 0x217   :  { %930 = vperm.xlu0 %1673, %v2540_v54  }
 0x21c   :  { %802 = vperm.xlu2 %1667, %v2540_v54   ;;  %v679_v34 = vpop.permute.xlu2 %678  ;;  %798 = vperm.xlu1 %1666, %v2547_v30   ;;  %v643_v3 = vpop.permute.xlu1 %642 }
 0x21d   :  { %v2545_v15 = vsel %vm1217_vm8, %v2397_v44, %v679_v34  ;;  %v1220_v36 = vsel %vm1217_vm8, %v2373_v58, %v643_v3  ;;  %v727_v52 = vpop.permute.xlu0 %726 }
 0x21e   :  { %v2553_v18 = vsel %vm1234_vm9, %v1220_v36, %v707_v39 }
 0x21f   :  { %942 = vperm.xlu0 %1673, %v2556_v61  }
 0x224   :  { %814 = vperm.xlu2 %1667, %v2556_v61   ;;  %v691_v10 = vpop.permute.xlu2 %690  ;;  %810 = vperm.xlu1 %1666, %v2563_v29   ;;  %v651_v17 = vpop.permute.xlu1 %650 }
 0x225   :  { %v2561_v44 = vsel %vm1217_vm8, %v2410_v5, %v691_v10  ;;  %v1222_v58 = vsel %vm1217_vm8, %v2393_v0, %v651_v17  ;;  %v2573_v5 = vld [vmem:[#allocation2] sm:$0xff]  ;;  %v739_v26 = vpop.permute.xlu0 %738 }
 0x227   :  { %1674 = vset.pattern.permute.xlu0 %v1765_v27 }
 0x228   :  { %954 = vperm.xlu0 %1674, %v2573_v5  }
 0x22c   :  { %1668 = vset.pattern.permute.xlu2 %v1763_v62  ;;  %822 = vperm.xlu1 %1666, %v2570_v63   ;;  %v663_v1 = vpop.permute.xlu1 %662 }
 0x22d   :  { %826 = vperm.xlu2 %1668, %v2573_v5   ;;  %v703_v42 = vpop.permute.xlu2 %702  ;;  %v1225_v55 = vsel %vm1217_vm8, %v2406_v19, %v663_v1  ;;  %v751_v23 = vpop.permute.xlu0 %750 }
 0x22e   :  { %v2580_v0 = vsel %vm1234_vm9, %v2437_v14, %v703_v42  ;;  %v2583_v53 = vsel %vm1234_vm9, %v1225_v55, %v727_v52 }
 0x230   :  { %974 = vperm.xlu0 %1674, %v2595_v47  }
 0x234   :  { %1670 = vset.pattern.permute.xlu1 %v1763_v62  ;;  %v675_v13 = vpop.permute.xlu1 %674 }
 0x235   :  { %838 = vperm.xlu2 %1668, %v2517_v37   ;;  %v715_v40 = vpop.permute.xlu2 %714  ;;  %v1228_v20 = vsel %vm1217_vm8, %v2432_v48, %v675_v13  ;;  %834 = vperm.xlu1 %1670, %v2493_v59  }
 0x236   :  { %v1239_v19 = vsel %vm1234_vm9, %v1222_v58, %v715_v40  ;;  %v2593_v14 = vsel %vm1234_vm9, %v1228_v20, %v739_v26  ;;  %v1766_v40 = vmov 15  }
 0x238   :  { %986 = vperm.xlu0 %1674, %v2610_v45  }
 0x23c   :  { %v687_v43 = vpop.permute.xlu1 %686 }
 0x23d   :  { %846 = vperm.xlu2 %1668, %v2595_v47   ;;  %v723_v62 = vpop.permute.xlu2 %722  ;;  %v1231_v38 = vsel %vm1217_vm8, %v2448_v7, %v687_v43  ;;  %842 = vperm.xlu1 %1670, %v2508_v51   ;;  %v763_v7 = vpop.permute.xlu0 %762 }
 0x23e   :  { %v2602_v48 = vsel %vm1234_vm9, %v2477_v11, %v723_v62  ;;  %v2606_v4 = vsel %vm1234_vm9, %v1231_v38, %v751_v23 }
 0x240   :  { %998 = vperm.xlu0 %1674, %v2624_v28  }
 0x245   :  { %858 = vperm.xlu2 %1668, %v2610_v45   ;;  %v735_v57 = vpop.permute.xlu2 %734  ;;  %854 = vperm.xlu1 %1670, %v2523_v35   ;;  %v699_v22 = vpop.permute.xlu1 %698 }
 0x246   :  { %v2615_v11 = vsel %vm1234_vm9, %v2505_v12, %v735_v57  ;;  %v1235_v33 = vsel %vm1234_vm9, %v2472_v24, %v699_v22  ;;  %v783_v50 = vpop.permute.xlu0 %782 }
 0x247   :  { %v2621_v32 = vsel %vm1251_vm10, %v1235_v33, %v763_v7 }
 0x248   :  { %1010 = vperm.xlu0 %1674, %v2635_v8  }
 0x24d   :  { %870 = vperm.xlu2 %1668, %v2624_v28   ;;  %v747_v56 = vpop.permute.xlu2 %746  ;;  %866 = vperm.xlu1 %1670, %v2540_v54   ;;  %v711_v21 = vpop.permute.xlu1 %710 }
 0x24e   :  { %v2629_v12 = vsel %vm1234_vm9, %v2521_v16, %v747_v56  ;;  %v1238_v24 = vsel %vm1234_vm9, %v2499_v6, %v711_v21  ;;  %v795_v6 = vpop.permute.xlu0 %794 }
 0x250   :  { %1678 = vset.pattern.permute.xlu0 %v1766_v40 }
 0x251   :  { %1022 = vperm.xlu0 %1678, %v2501_v60  }
 0x255   :  { %882 = vperm.xlu2 %1668, %v2635_v8   ;;  %v759_v41 = vpop.permute.xlu2 %758  ;;  %878 = vperm.xlu1 %1670, %v2556_v61   ;;  %v719_v16 = vpop.permute.xlu1 %718 }
 0x256   :  { %v2640_v31 = vsel %vm1234_vm9, %v2536_v49, %v759_v41  ;;  %v1240_v34 = vsel %vm1234_vm9, %v2515_v25, %v719_v16  ;;  %v807_v17 = vpop.permute.xlu0 %806 }
 0x257   :  { %v2646_v39 = vsel %vm1251_vm10, %v1240_v34, %v783_v50 }
 0x259   :  { %1042 = vperm.xlu0 %1678, %v2532_v2  }
 0x25d   :  { %1672 = vset.pattern.permute.xlu2 %v1764_v9  ;;  %1671 = vset.pattern.permute.xlu1 %v1764_v9  ;;  %v731_v3 = vpop.permute.xlu1 %730 }
 0x25e   :  { %894 = vperm.xlu2 %1672, %v2501_v60   ;;  %v771_v49 = vpop.permute.xlu2 %770  ;;  %v1243_v36 = vsel %vm1234_vm9, %v2530_v46, %v731_v3  ;;  %890 = vperm.xlu1 %1671, %v2573_v5   ;;  %v819_v1 = vpop.permute.xlu0 %818 }
 0x25f   :  { %v2656_v25 = vsel %vm1251_vm10, %v2553_v18, %v771_v49  ;;  %v2660_v10 = vsel %vm1251_vm10, %v1243_v36, %v795_v6 }
 0x261   :  { %1054 = vperm.xlu0 %1678, %v2547_v30  }
 0x265   :  { %v743_v9 = vpop.permute.xlu1 %742 }
 0x266   :  { %906 = vperm.xlu2 %1672, %v2508_v51   ;;  %v779_v58 = vpop.permute.xlu2 %778  ;;  %v1246_v52 = vsel %vm1234_vm9, %v2545_v15, %v743_v9  ;;  %902 = vperm.xlu1 %1671, %v2517_v37  }
 0x267   :  { %v2667_v46 = vsel %vm1251_vm10, %v1239_v19, %v779_v58  ;;  %v2671_v18 = vsel %vm1251_vm10, %v1246_v52, %v807_v17  ;;  %v831_v19 = vpop.permute.xlu0 %830 }
 0x269   :  { %1066 = vperm.xlu0 %1678, %v2563_v29  }
 0x26d   :  { %v755_v42 = vpop.permute.xlu1 %754 }
 0x26e   :  { %914 = vperm.xlu2 %1672, %v2532_v2   ;;  %v791_v55 = vpop.permute.xlu2 %790  ;;  %v1249_v26 = vsel %vm1234_vm9, %v2561_v44, %v755_v42  ;;  %910 = vperm.xlu1 %1671, %v2595_v47  }
 0x26f   :  { %v2678_v13 = vsel %vm1251_vm10, %v2583_v53, %v791_v55  ;;  %v2682_v15 = vsel %vm1251_vm10, %v1249_v26, %v819_v1  ;;  %v851_v57 = vpop.permute.xlu0 %850 }
 0x271   :  { %1078 = vperm.xlu0 %1678, %v2570_v63  }
 0x276   :  { %926 = vperm.xlu2 %1672, %v2547_v30   ;;  %v803_v20 = vpop.permute.xlu2 %802  ;;  %922 = vperm.xlu1 %1671, %v2610_v45   ;;  %v767_v53 = vpop.permute.xlu1 %766 }
 0x277   :  { %v2689_v44 = vsel %vm1251_vm10, %v2593_v14, %v803_v20  ;;  %v1253_v23 = vsel %vm1251_vm10, %v2580_v0, %v767_v53  ;;  %v863_v21 = vpop.permute.xlu0 %862 }
 0x278   :  { %v2695_v43 = vsel %vm1268_vm11, %v1253_v23, %v831_v19 }
 0x27e   :  { %938 = vperm.xlu2 %1672, %v2563_v29   ;;  %v815_v62 = vpop.permute.xlu2 %814  ;;  %934 = vperm.xlu1 %1671, %v2624_v28   ;;  %v775_v14 = vpop.permute.xlu1 %774 }
 0x27f   :  { %v2701_v38 = vsel %vm1251_vm10, %v2606_v4, %v815_v62  ;;  %v1255_v7 = vsel %vm1251_vm10, %v1238_v24, %v775_v14  ;;  %v875_v16 = vpop.permute.xlu0 %874 }
 0x286   :  { %950 = vperm.xlu2 %1672, %v2570_v63   ;;  %946 = vperm.xlu1 %1671, %v2635_v8   ;;  %v787_v0 = vpop.permute.xlu1 %786 }
 0x287   :  { %v827_v22 = vpop.permute.xlu2 %826  ;;  %v1258_v33 = vsel %vm1251_vm10, %v2602_v48, %v787_v0  ;;  %v887_v3 = vpop.permute.xlu0 %886 }
 0x288   :  { %v2712_v4 = vsel %vm1268_vm11, %v2621_v32, %v827_v22  ;;  %v2715_v56 = vsel %vm1268_vm11, %v1258_v33, %v851_v57 }
 0x28e   :  { %1676 = vset.pattern.permute.xlu2 %v1765_v27  ;;  %1675 = vset.pattern.permute.xlu1 %v1765_v27  ;;  %v799_v50 = vpop.permute.xlu1 %798 }
 0x28f   :  { %962 = vperm.xlu2 %1676, %v2493_v59   ;;  %v839_v24 = vpop.permute.xlu2 %838  ;;  %v1261_v48 = vsel %vm1251_vm10, %v2615_v11, %v799_v50  ;;  %958 = vperm.xlu1 %1675, %v2501_v60   ;;  %v899_v58 = vpop.permute.xlu0 %898 }
 0x290   :  { %v2724_v32 = vsel %vm1268_vm11, %v1255_v7, %v839_v24  ;;  %v1278_v41 = vsel %vm1268_vm11, %v1261_v48, %v863_v21 }
 0x296   :  { %v811_v34 = vpop.permute.xlu1 %810 }
 0x297   :  { %970 = vperm.xlu2 %1676, %v2508_v51   ;;  %v847_v27 = vpop.permute.xlu2 %846  ;;  %v1264_v6 = vsel %vm1251_vm10, %v2629_v12, %v811_v34  ;;  %966 = vperm.xlu1 %1675, %v2517_v37  }
 0x298   :  { %v2734_v11 = vsel %vm1268_vm11, %v2646_v39, %v847_v27  ;;  %v1281_v60 = vsel %vm1268_vm11, %v1264_v6, %v875_v16 }
 0x29e   :  { %v823_v49 = vpop.permute.xlu1 %822 }
 0x29f   :  { %982 = vperm.xlu2 %1676, %v2523_v35   ;;  %v859_v36 = vpop.permute.xlu2 %858  ;;  %v1267_v17 = vsel %vm1251_vm10, %v2640_v31, %v823_v49  ;;  %978 = vperm.xlu1 %1675, %v2532_v2  }
 0x2a0   :  { %v2743_v9 = vsel %vm1268_vm11, %v2660_v10, %v859_v36  ;;  %v1284_v12 = vsel %vm1268_vm11, %v1267_v17, %v887_v3 }
 0x2a7   :  { %994 = vperm.xlu2 %1676, %v2540_v54   ;;  %v871_v39 = vpop.permute.xlu2 %870  ;;  %990 = vperm.xlu1 %1675, %v2547_v30   ;;  %v835_v31 = vpop.permute.xlu1 %834 }
 0x2a8   :  { %v2750_v52 = vsel %vm1268_vm11, %v2671_v18, %v871_v39  ;;  %v1271_v10 = vsel %vm1268_vm11, %v2656_v25, %v835_v31  ;;  %v919_v30 = vpop.permute.xlu0 %918 }
 0x2a9   :  { %v1288_v1 = vsel %vm1285_vm12, %v1271_v10, %v899_v58 }
 0x2af   :  { %1006 = vperm.xlu2 %1676, %v2556_v61   ;;  %v883_v2 = vpop.permute.xlu2 %882  ;;  %1002 = vperm.xlu1 %1675, %v2563_v29   ;;  %v843_v55 = vpop.permute.xlu1 %842 }
 0x2b0   :  { %v2759_v42 = vsel %vm1268_vm11, %v2682_v15, %v883_v2  ;;  %v1273_v18 = vsel %vm1268_vm11, %v2667_v46, %v843_v55  ;;  %v931_v19 = vpop.permute.xlu0 %930 }
 0x2b7   :  { %1677 = vset.pattern.permute.xlu2 %v1766_v40  ;;  %1014 = vperm.xlu1 %1675, %v2570_v63   ;;  %v855_v25 = vpop.permute.xlu1 %854 }
 0x2b8   :  { %1018 = vperm.xlu2 %1677, %v2573_v5   ;;  %v895_v26 = vpop.permute.xlu2 %894  ;;  %v1276_v20 = vsel %vm1268_vm11, %v2678_v13, %v855_v25  ;;  %v943_v23 = vpop.permute.xlu0 %942 }
 0x2b9   :  { %v2771_v15 = vsel %vm1285_vm12, %v2695_v43, %v895_v26  ;;  %v1293_v29 = vsel %vm1285_vm12, %v1276_v20, %v919_v30 }
 0x2bf   :  { %1679 = vset.pattern.permute.xlu1 %v1766_v40  ;;  %v867_v46 = vpop.permute.xlu1 %866 }
 0x2c0   :  { %1030 = vperm.xlu2 %1677, %v2517_v37   ;;  %v907_v63 = vpop.permute.xlu2 %906  ;;  %v1279_v5 = vsel %vm1268_vm11, %v2689_v44, %v867_v46  ;;  %1026 = vperm.xlu1 %1679, %v2493_v59   ;;  %v2797_v57 = vpop.permute.xlu0 %954 }
 0x2c1   :  { %v1290_v53 = vsel %vm1285_vm12, %v1273_v18, %v907_v63  ;;  %v1296_v13 = vsel %vm1285_vm12, %v1279_v5, %v931_v19 }
 0x2c7   :  { %v879_v43 = vpop.permute.xlu1 %878 }
 0x2c8   :  { %1038 = vperm.xlu2 %1677, %v2595_v47   ;;  %v915_v62 = vpop.permute.xlu2 %914  ;;  %v1282_v40 = vsel %vm1268_vm11, %v2701_v38, %v879_v43  ;;  %1034 = vperm.xlu1 %1679, %v2508_v51  }
 0x2c9   :  { %v2786_v37 = vsel %vm1285_vm12, %v2715_v56, %v915_v62  ;;  %v1299_v44 = vsel %vm1285_vm12, %v1282_v40, %v943_v23 }
 0x2d0   :  { %1050 = vperm.xlu2 %1677, %v2610_v45   ;;  %v927_v59 = vpop.permute.xlu2 %926  ;;  %1046 = vperm.xlu1 %1679, %v2523_v35   ;;  %v2795_v47 = vpop.permute.xlu1 %890 }
 0x2d1   :  { %v2792_v14 = vsel %vm1285_vm12, %v1278_v41, %v927_v59  ;;  %v975_v45 = vpop.permute.xlu0 %974 }
 0x2d8   :  { %1062 = vperm.xlu2 %1677, %v2624_v28   ;;  %v939_v38 = vpop.permute.xlu2 %938  ;;  %1058 = vperm.xlu1 %1679, %v2540_v54   ;;  %v903_v51 = vpop.permute.xlu1 %902 }
 0x2d9   :  { %v2801_v7 = vsel %vm1285_vm12, %v1281_v60, %v939_v38  ;;  %v2806_v0 = vsel %vm1285_vm12, %v2724_v32, %v903_v51  ;;  %v987_v56 = vpop.permute.xlu0 %986 }
 0x2e0   :  { %1074 = vperm.xlu2 %1677, %v2635_v8   ;;  %v951_v35 = vpop.permute.xlu2 %950  ;;  %1070 = vperm.xlu1 %1679, %v2556_v61   ;;  %v911_v28 = vpop.permute.xlu1 %910 }
 0x2e1   :  { %v2810_v22 = vsel %vm1285_vm12, %v1284_v12, %v951_v35  ;;  %v1291_v33 = vsel %vm1285_vm12, %v2734_v11, %v911_v28  ;;  %v999_v61 = vpop.permute.xlu0 %998 }
 0x2e2   :  { %v2816_v54 = vsel %vm1302_vm13, %v1291_v33, %v975_v45 }
 0x2e8   :  { %v923_v21 = vpop.permute.xlu1 %922 }
 0x2e9   :  { %v963_v50 = vpop.permute.xlu2 %962  ;;  %v1294_v8 = vsel %vm1285_vm12, %v2743_v9, %v923_v21  ;;  %v1011_v6 = vpop.permute.xlu0 %1010 }
 0x2ea   :  { %v2821_v24 = vsel %vm1302_vm13, %v1288_v1, %v963_v50  ;;  %v2824_v48 = vsel %vm1302_vm13, %v1294_v8, %v987_v56 }
 0x2f0   :  { %v935_v32 = vpop.permute.xlu1 %934 }
 0x2f1   :  { %v971_v41 = vpop.permute.xlu2 %970  ;;  %v1297_v16 = vsel %vm1285_vm12, %v2750_v52, %v935_v32  ;;  %v1023_v9 = vpop.permute.xlu0 %1022 }
 0x2f2   :  { %v2829_v34 = vsel %vm1302_vm13, %v1290_v53, %v971_v41  ;;  %v2832_v27 = vsel %vm1302_vm13, %v1297_v16, %v999_v61 }
 0x2f8   :  { %v947_v11 = vpop.permute.xlu1 %946 }
 0x2f9   :  { %v983_v60 = vpop.permute.xlu2 %982  ;;  %v1300_v3 = vsel %vm1285_vm12, %v2759_v42, %v947_v11  ;;  %v1043_v43 = vpop.permute.xlu0 %1042 }
 0x2fa   :  { %v2837_v49 = vsel %vm1302_vm13, %v1293_v29, %v983_v60  ;;  %v2840_v36 = vsel %vm1302_vm13, %v1300_v3, %v1011_v6 }
 0x301   :  { %v995_v17 = vpop.permute.xlu2 %994  ;;  %v959_v39 = vpop.permute.xlu1 %958 }
 0x302   :  { %v2843_v12 = vsel %vm1302_vm13, %v1296_v13, %v995_v17  ;;  %v1304_v58 = vsel %vm1302_vm13, %v2771_v15, %v959_v39  ;;  %v1286_v15 = vsel %vm1285_vm12, %v2712_v4, %v2795_v47  ;;  %v1055_v16 = vpop.permute.xlu0 %1054 }
 0x303   :  { %v1321_v52 = vsel %vm1319_vm14, %v1304_v58, %v1023_v9  ;;  %v1303_v29 = vsel %vm1302_vm13, %v1286_v15, %v2797_v57 }
 0x304   :  { %v1465_v31 = vperm.slane %v1321_v52, 0  ;;  %v1481_v10 = vperm.slane %v1321_v52, 1  ;;  %v1497_v1 = vperm.slane %v1321_v52, 2  ;;  %v1513_v2 = vperm.slane %v1321_v52, 3 }
 0x305   :  { %v1529_v42 = vperm.slane %v1321_v52, 4  ;;  %v1545_v55 = vperm.slane %v1321_v52, 5  ;;  %v1561_v18 = vperm.slane %v1321_v52, 6  ;;  %v1577_v25 = vperm.slane %v1321_v52, 7 }
 0x306   :  { %1473 = vst.msk [vmem:[#allocation5 + $0x10] sm:$0x3] %vm1344_vm15, %v1465_v31 }
 0x307   :  { %1489 = vst.msk [vmem:[#allocation5 + $0x12] sm:$0x3] %vm1344_vm15, %v1481_v10 }
 0x308   :  { %1505 = vst.msk [vmem:[#allocation5 + $0x14] sm:$0x3] %vm1344_vm15, %v1497_v1 }
 0x309   :  { %v1007_v30 = vpop.permute.xlu2 %1006  ;;  %1521 = vst.msk [vmem:[#allocation5 + $0x16] sm:$0x3] %vm1344_vm15, %v1513_v2  ;;  %v967_v20 = vpop.permute.xlu1 %966 }
 0x30a   :  { %v2853_v26 = vsel %vm1302_vm13, %v1299_v44, %v1007_v30  ;;  %1537 = vst.msk [vmem:[#allocation5 + $0x18] sm:$0x3] %vm1344_vm15, %v1529_v42  ;;  %v1306_v35 = vsel %vm1302_vm13, %v2806_v0, %v967_v20 }
 0x30b   :  { %1553 = vst.msk [vmem:[#allocation5 + $0x1a] sm:$0x3] %vm1344_vm15, %v1545_v55 }
 0x30c   :  { %1569 = vst.msk [vmem:[#allocation5 + $0x1c] sm:$0x3] %vm1344_vm15, %v1561_v18 }
 0x30d   :  { %1585 = vst.msk [vmem:[#allocation5 + $0x1e] sm:$0x3] %vm1344_vm15, %v1577_v25 }
 0x311   :  { %v979_v19 = vpop.permute.xlu1 %978 }
 0x312   :  { %v1019_v46 = vpop.permute.xlu2 %1018  ;;  %v1309_v5 = vsel %vm1302_vm13, %v2786_v37, %v979_v19 }
 0x313   :  { %v1320_v63 = vsel %vm1319_vm14, %v1303_v29, %v1019_v46  ;;  %v1326_v44 = vsel %vm1319_vm14, %v1309_v5, %v1043_v43 }
 0x314   :  { %v1336_v53 = vperm.slane %v1320_v63, 0  ;;  %v1353_v13 = vperm.slane %v1320_v63, 1  ;;  %v1369_v23 = vperm.slane %v1320_v63, 2  ;;  %v1385_v62 = vperm.slane %v1320_v63, 3 }
 0x315   :  { %v1401_v40 = vperm.slane %v1320_v63, 4  ;;  %v1417_v4 = vperm.slane %v1320_v63, 5  ;;  %v1433_v59 = vperm.slane %v1320_v63, 6  ;;  %v1449_v47 = vperm.slane %v1320_v63, 7 }
 0x316   :  { %1345 = vst.msk [vmem:[#allocation5] sm:$0x3] %vm1344_vm15, %v1336_v53  ;;  %v1339_v37 = vperm.slane %v1326_v44, 0  ;;  %v1356_v57 = vperm.slane %v1326_v44, 1  ;;  %v1372_v38 = vperm.slane %v1326_v44, 2  ;;  %v1388_v45 = vperm.slane %v1326_v44, 3 }
 0x317   :  { %1361 = vst.msk [vmem:[#allocation5 + $0x2] sm:$0x3] %vm1344_vm15, %v1353_v13  ;;  %v1404_v28 = vperm.slane %v1326_v44, 4  ;;  %v1420_v33 = vperm.slane %v1326_v44, 5  ;;  %v1436_v21 = vperm.slane %v1326_v44, 6  ;;  %v1452_v50 = vperm.slane %v1326_v44, 7 }
 0x318   :  { %1377 = vst.msk [vmem:[#allocation5 + $0x4] sm:$0x3] %vm1344_vm15, %v1369_v23 }
 0x319   :  { %1393 = vst.msk [vmem:[#allocation5 + $0x6] sm:$0x3] %vm1344_vm15, %v1385_v62  ;;  %v991_v8 = vpop.permute.xlu1 %990 }
 0x31a   :  { %1409 = vst.msk [vmem:[#allocation5 + $0x8] sm:$0x3] %vm1344_vm15, %v1401_v40  ;;  %v1031_v51 = vpop.permute.xlu2 %1030  ;;  %v1312_v32 = vsel %vm1302_vm13, %v2792_v14, %v991_v8 }
 0x31b   :  { %1425 = vst.msk [vmem:[#allocation5 + $0xa] sm:$0x3] %vm1344_vm15, %v1417_v4  ;;  %v1323_v56 = vsel %vm1319_vm14, %v1306_v35, %v1031_v51  ;;  %v1329_v3 = vsel %vm1319_vm14, %v1312_v32, %v1055_v16 }
 0x31c   :  { %1441 = vst.msk [vmem:[#allocation5 + $0xc] sm:$0x3] %vm1344_vm15, %v1433_v59  ;;  %v1466_v61 = vperm.slane %v1323_v56, 0  ;;  %v1482_v0 = vperm.slane %v1323_v56, 1  ;;  %v1498_v41 = vperm.slane %v1323_v56, 2  ;;  %v1514_v6 = vperm.slane %v1323_v56, 3 }
 0x31d   :  { %1457 = vst.msk [vmem:[#allocation5 + $0xe] sm:$0x3] %vm1344_vm15, %v1449_v47  ;;  %v1530_v11 = vperm.slane %v1323_v56, 4  ;;  %v1546_v60 = vperm.slane %v1323_v56, 5  ;;  %v1562_v17 = vperm.slane %v1323_v56, 6  ;;  %v1578_v9 = vperm.slane %v1323_v56, 7 }
 0x31e   :  { %1348 = vst.msk [vmem:[#allocation5 + $0x60] sm:$0x3] %vm1344_vm15, %v1339_v37  ;;  %v1469_v14 = vperm.slane %v1329_v3, 0  ;;  %v1485_v39 = vperm.slane %v1329_v3, 1  ;;  %v1501_v58 = vperm.slane %v1329_v3, 2  ;;  %v1517_v31 = vperm.slane %v1329_v3, 3 }
 0x31f   :  { %1364 = vst.msk [vmem:[#allocation5 + $0x62] sm:$0x3] %vm1344_vm15, %v1356_v57  ;;  %v1533_v10 = vperm.slane %v1329_v3, 4  ;;  %v1549_v1 = vperm.slane %v1329_v3, 5  ;;  %v1565_v42 = vperm.slane %v1329_v3, 6  ;;  %v1581_v55 = vperm.slane %v1329_v3, 7 }
 0x320   :  { %1380 = vst.msk [vmem:[#allocation5 + $0x64] sm:$0x3] %vm1344_vm15, %v1372_v38 }
 0x321   :  { %1396 = vst.msk [vmem:[#allocation5 + $0x66] sm:$0x3] %vm1344_vm15, %v1388_v45  ;;  %v1003_v18 = vpop.permute.xlu1 %1002 }
 0x322   :  { %1412 = vst.msk [vmem:[#allocation5 + $0x68] sm:$0x3] %vm1344_vm15, %v1404_v28  ;;  %v1039_v52 = vpop.permute.xlu2 %1038  ;;  %v1315_v20 = vsel %vm1302_vm13, %v2801_v7, %v1003_v18 }
 0x323   :  { %1428 = vst.msk [vmem:[#allocation5 + $0x6a] sm:$0x3] %vm1344_vm15, %v1420_v33  ;;  %v1325_v2 = vsel %vm1319_vm14, %v2816_v54, %v1039_v52  ;;  %v1067_v54 = vpop.permute.xlu0 %1066 }
 0x324   :  { %1444 = vst.msk [vmem:[#allocation5 + $0x6c] sm:$0x3] %vm1344_vm15, %v1436_v21  ;;  %v1467_v30 = vperm.slane %v1325_v2, 0  ;;  %v1483_v25 = vperm.slane %v1325_v2, 1  ;;  %v1499_v15 = vperm.slane %v1325_v2, 2  ;;  %v1515_v29 = vperm.slane %v1325_v2, 3 }
 0x325   :  { %1460 = vst.msk [vmem:[#allocation5 + $0x6e] sm:$0x3] %vm1344_vm15, %v1452_v50  ;;  %v1531_v19 = vperm.slane %v1325_v2, 4  ;;  %v1547_v46 = vperm.slane %v1325_v2, 5  ;;  %v1332_v63 = vsel %vm1319_vm14, %v1315_v20, %v1067_v54  ;;  %v1563_v5 = vperm.slane %v1325_v2, 6 }
 0x326   :  { %1474 = vst.msk [vmem:[#allocation5 + $0x30] sm:$0x3] %vm1344_vm15, %v1466_v61  ;;  %v1579_v53 = vperm.slane %v1325_v2, 7  ;;  %v1342_v7 = vperm.slane %v1332_v63, 0  ;;  %v1359_v13 = vperm.slane %v1332_v63, 1  ;;  %v1375_v23 = vperm.slane %v1332_v63, 2 }
 0x327   :  { %1490 = vst.msk [vmem:[#allocation5 + $0x32] sm:$0x3] %vm1344_vm15, %v1482_v0  ;;  %v1391_v62 = vperm.slane %v1332_v63, 3  ;;  %v1407_v40 = vperm.slane %v1332_v63, 4  ;;  %v1423_v4 = vperm.slane %v1332_v63, 5  ;;  %v1439_v59 = vperm.slane %v1332_v63, 6 }
 0x328   :  { %1506 = vst.msk [vmem:[#allocation5 + $0x34] sm:$0x3] %vm1344_vm15, %v1498_v41  ;;  %v1455_v47 = vperm.slane %v1332_v63, 7 }
 0x329   :  { %1522 = vst.msk [vmem:[#allocation5 + $0x36] sm:$0x3] %vm1344_vm15, %v1514_v6  ;;  %v1015_v37 = vpop.permute.xlu1 %1014 }
 0x32a   :  { %1538 = vst.msk [vmem:[#allocation5 + $0x38] sm:$0x3] %vm1344_vm15, %v1530_v11  ;;  %v1051_v43 = vpop.permute.xlu2 %1050  ;;  %v1318_v51 = vsel %vm1302_vm13, %v2810_v22, %v1015_v37 }
 0x32b   :  { %1554 = vst.msk [vmem:[#allocation5 + $0x3a] sm:$0x3] %vm1344_vm15, %v1546_v60  ;;  %v1328_v44 = vsel %vm1319_vm14, %v2824_v48, %v1051_v43  ;;  %v1079_v48 = vpop.permute.xlu0 %1078 }
 0x32c   :  { %1570 = vst.msk [vmem:[#allocation5 + $0x3c] sm:$0x3] %vm1344_vm15, %v1562_v17  ;;  %v1340_v57 = vperm.slane %v1328_v44, 0  ;;  %v1357_v38 = vperm.slane %v1328_v44, 1  ;;  %v1373_v45 = vperm.slane %v1328_v44, 2  ;;  %v1389_v35 = vperm.slane %v1328_v44, 3 }
 0x32d   :  { %1586 = vst.msk [vmem:[#allocation5 + $0x3e] sm:$0x3] %vm1344_vm15, %v1578_v9  ;;  %v1405_v28 = vperm.slane %v1328_v44, 4  ;;  %v1421_v33 = vperm.slane %v1328_v44, 5  ;;  %v1335_v56 = vsel %vm1319_vm14, %v1318_v51, %v1079_v48  ;;  %v1437_v21 = vperm.slane %v1328_v44, 6 }
 0x32e   :  { %1477 = vst.msk [vmem:[#allocation5 + $0x90] sm:$0x3] %vm1344_vm15, %v1469_v14  ;;  %v1453_v50 = vperm.slane %v1328_v44, 7  ;;  %v1472_v22 = vperm.slane %v1335_v56, 0  ;;  %v1488_v8 = vperm.slane %v1335_v56, 1  ;;  %v1504_v61 = vperm.slane %v1335_v56, 2 }
 0x32f   :  { %1493 = vst.msk [vmem:[#allocation5 + $0x92] sm:$0x3] %vm1344_vm15, %v1485_v39  ;;  %v1520_v32 = vperm.slane %v1335_v56, 3  ;;  %v1536_v41 = vperm.slane %v1335_v56, 4  ;;  %v1552_v16 = vperm.slane %v1335_v56, 5  ;;  %v1568_v11 = vperm.slane %v1335_v56, 6 }
 0x330   :  { %1509 = vst.msk [vmem:[#allocation5 + $0x94] sm:$0x3] %vm1344_vm15, %v1501_v58  ;;  %v1584_v60 = vperm.slane %v1335_v56, 7 }
 0x331   :  { %1525 = vst.msk [vmem:[#allocation5 + $0x96] sm:$0x3] %vm1344_vm15, %v1517_v31 }
 0x332   :  { %1541 = vst.msk [vmem:[#allocation5 + $0x98] sm:$0x3] %vm1344_vm15, %v1533_v10  ;;  %v1063_v0 = vpop.permute.xlu2 %1062  ;;  %v1027_v14 = vpop.permute.xlu1 %1026 }
 0x333   :  { %1557 = vst.msk [vmem:[#allocation5 + $0x9a] sm:$0x3] %vm1344_vm15, %v1549_v1  ;;  %v1331_v6 = vsel %vm1319_vm14, %v2832_v27, %v1063_v0  ;;  %v1322_v52 = vsel %vm1319_vm14, %v2821_v24, %v1027_v14 }
 0x334   :  { %1573 = vst.msk [vmem:[#allocation5 + $0x9c] sm:$0x3] %vm1344_vm15, %v1565_v42  ;;  %v1470_v3 = vperm.slane %v1331_v6, 0  ;;  %v1486_v17 = vperm.slane %v1331_v6, 1  ;;  %v1502_v9 = vperm.slane %v1331_v6, 2  ;;  %v1518_v39 = vperm.slane %v1331_v6, 3 }
 0x335   :  { %1589 = vst.msk [vmem:[#allocation5 + $0x9e] sm:$0x3] %vm1344_vm15, %v1581_v55  ;;  %v1534_v27 = vperm.slane %v1331_v6, 4  ;;  %v1550_v58 = vperm.slane %v1331_v6, 5  ;;  %v1566_v31 = vperm.slane %v1331_v6, 6  ;;  %v1582_v10 = vperm.slane %v1331_v6, 7 }
 0x336   :  { %1475 = vst.msk [vmem:[#allocation5 + $0x50] sm:$0x3] %vm1344_vm15, %v1467_v30  ;;  %v1337_v1 = vperm.slane %v1322_v52, 0  ;;  %v1354_v2 = vperm.slane %v1322_v52, 1  ;;  %v1370_v42 = vperm.slane %v1322_v52, 2  ;;  %v1386_v18 = vperm.slane %v1322_v52, 3 }
 0x337   :  { %1491 = vst.msk [vmem:[#allocation5 + $0x52] sm:$0x3] %vm1344_vm15, %v1483_v25  ;;  %v1402_v24 = vperm.slane %v1322_v52, 4  ;;  %v1418_v25 = vperm.slane %v1322_v52, 5  ;;  %v1450_v54 = vperm.slane %v1322_v52, 7 }
 0x338   :  { %1507 = vst.msk [vmem:[#allocation5 + $0x54] sm:$0x3] %vm1344_vm15, %v1499_v15  ;;  %v1434_v15 = vperm.slane %v1322_v52, 6 }
 0x339   :  { %1523 = vst.msk [vmem:[#allocation5 + $0x56] sm:$0x3] %vm1344_vm15, %v1515_v29 }
 0x33a   :  { %1539 = vst.msk [vmem:[#allocation5 + $0x58] sm:$0x3] %vm1344_vm15, %v1531_v19  ;;  %v1075_v55 = vpop.permute.xlu2 %1074  ;;  %v1035_v30 = vpop.permute.xlu1 %1034 }
 0x33b   :  { %1555 = vst.msk [vmem:[#allocation5 + $0x5a] sm:$0x3] %vm1344_vm15, %v1547_v46  ;;  %v1334_v20 = vsel %vm1319_vm14, %v2840_v36, %v1075_v55 }
 0x33c   :  { %1571 = vst.msk [vmem:[#allocation5 + $0x5c] sm:$0x3] %vm1344_vm15, %v1563_v5  ;;  %v1343_v29 = vperm.slane %v1334_v20, 0  ;;  %v1360_v19 = vperm.slane %v1334_v20, 1  ;;  %v1376_v46 = vperm.slane %v1334_v20, 2  ;;  %v1392_v63 = vperm.slane %v1334_v20, 3 }
 0x33d   :  { %1587 = vst.msk [vmem:[#allocation5 + $0x5e] sm:$0x3] %vm1344_vm15, %v1579_v53  ;;  %v1408_v36 = vperm.slane %v1334_v20, 4  ;;  %v1424_v5 = vperm.slane %v1334_v20, 5  ;;  %v1324_v53 = vsel %vm1319_vm14, %v2829_v34, %v1035_v30 }
 0x33e   :  { %1351 = vst.msk [vmem:[#allocation5 + $0xc0] sm:$0x3] %vm1344_vm15, %v1342_v7  ;;  %v1440_v7 = vperm.slane %v1334_v20, 6  ;;  %v1338_v43 = vperm.slane %v1324_v53, 0  ;;  %v1403_v34 = vperm.slane %v1324_v53, 4  ;;  %v1419_v44 = vperm.slane %v1324_v53, 5 }
 0x33f   :  { %1367 = vst.msk [vmem:[#allocation5 + $0xc2] sm:$0x3] %vm1344_vm15, %v1359_v13  ;;  %v1451_v37 = vperm.slane %v1324_v53, 7 }
 0x340   :  { %1383 = vst.msk [vmem:[#allocation5 + $0xc4] sm:$0x3] %vm1344_vm15, %v1375_v23  ;;  %v1456_v23 = vperm.slane %v1334_v20, 7 }
 0x341   :  { %1399 = vst.msk [vmem:[#allocation5 + $0xc6] sm:$0x3] %vm1344_vm15, %v1391_v62  ;;  %v1355_v62 = vperm.slane %v1324_v53, 1 }
 0x342   :  { %1415 = vst.msk [vmem:[#allocation5 + $0xc8] sm:$0x3] %vm1344_vm15, %v1407_v40  ;;  %v1047_v13 = vpop.permute.xlu1 %1046  ;;  %v1371_v40 = vperm.slane %v1324_v53, 2 }
 0x343   :  { %1431 = vst.msk [vmem:[#allocation5 + $0xca] sm:$0x3] %vm1344_vm15, %v1423_v4  ;;  %v1387_v4 = vperm.slane %v1324_v53, 3 }
 0x344   :  { %1447 = vst.msk [vmem:[#allocation5 + $0xcc] sm:$0x3] %vm1344_vm15, %v1439_v59  ;;  %v1327_v59 = vsel %vm1319_vm14, %v2837_v49, %v1047_v13 }
 0x345   :  { %1463 = vst.msk [vmem:[#allocation5 + $0xce] sm:$0x3] %vm1344_vm15, %v1455_v47  ;;  %v1435_v47 = vperm.slane %v1324_v53, 6  ;;  %v1484_v51 = vperm.slane %v1327_v59, 1  ;;  %v1516_v48 = vperm.slane %v1327_v59, 3  ;;  %v1532_v49 = vperm.slane %v1327_v59, 4 }
 0x346   :  { %1349 = vst.msk [vmem:[#allocation5 + $0x80] sm:$0x3] %vm1344_vm15, %v1340_v57  ;;  %v1468_v57 = vperm.slane %v1327_v59, 0  ;;  %v1580_v56 = vperm.slane %v1327_v59, 7 }
 0x347   :  { %1365 = vst.msk [vmem:[#allocation5 + $0x82] sm:$0x3] %vm1344_vm15, %v1357_v38 }
 0x348   :  { %1381 = vst.msk [vmem:[#allocation5 + $0x84] sm:$0x3] %vm1344_vm15, %v1373_v45  ;;  %v1500_v45 = vperm.slane %v1327_v59, 2 }
 0x349   :  { %1397 = vst.msk [vmem:[#allocation5 + $0x86] sm:$0x3] %vm1344_vm15, %v1389_v35  ;;  %v1548_v35 = vperm.slane %v1327_v59, 5 }
 0x34a   :  { %1413 = vst.msk [vmem:[#allocation5 + $0x88] sm:$0x3] %vm1344_vm15, %v1405_v28  ;;  %v1059_v38 = vpop.permute.xlu1 %1058 }
 0x34b   :  { %1429 = vst.msk [vmem:[#allocation5 + $0x8a] sm:$0x3] %vm1344_vm15, %v1421_v33  ;;  %v1330_v28 = vsel %vm1319_vm14, %v2843_v12, %v1059_v38  ;;  %v1564_v33 = vperm.slane %v1327_v59, 6 }
 0x34c   :  { %1445 = vst.msk [vmem:[#allocation5 + $0x8c] sm:$0x3] %vm1344_vm15, %v1437_v21  ;;  %v1341_v21 = vperm.slane %v1330_v28, 0  ;;  %v1406_v12 = vperm.slane %v1330_v28, 4  ;;  %v1422_v0 = vperm.slane %v1330_v28, 5 }
 0x34d   :  { %1461 = vst.msk [vmem:[#allocation5 + $0x8e] sm:$0x3] %vm1344_vm15, %v1453_v50  ;;  %v1358_v50 = vperm.slane %v1330_v28, 1 }
 0x34e   :  { %1480 = vst.msk [vmem:[#allocation5 + $0xf0] sm:$0x3] %vm1344_vm15, %v1472_v22  ;;  %v1374_v22 = vperm.slane %v1330_v28, 2 }
 0x34f   :  { %1496 = vst.msk [vmem:[#allocation5 + $0xf2] sm:$0x3] %vm1344_vm15, %v1488_v8 }
 0x350   :  { %1512 = vst.msk [vmem:[#allocation5 + $0xf4] sm:$0x3] %vm1344_vm15, %v1504_v61  ;;  %v1390_v61 = vperm.slane %v1330_v28, 3 }
 0x351   :  { %1528 = vst.msk [vmem:[#allocation5 + $0xf6] sm:$0x3] %vm1344_vm15, %v1520_v32 }
 0x352   :  { %1544 = vst.msk [vmem:[#allocation5 + $0xf8] sm:$0x3] %vm1344_vm15, %v1536_v41  ;;  %v1071_v8 = vpop.permute.xlu1 %1070  ;;  %v1438_v41 = vperm.slane %v1330_v28, 6 }
 0x353   :  { %1560 = vst.msk [vmem:[#allocation5 + $0xfa] sm:$0x3] %vm1344_vm15, %v1552_v16  ;;  %v1333_v32 = vsel %vm1319_vm14, %v2853_v26, %v1071_v8  ;;  %v1454_v16 = vperm.slane %v1330_v28, 7 }
 0x354   :  { %1576 = vst.msk [vmem:[#allocation5 + $0xfc] sm:$0x3] %vm1344_vm15, %v1568_v11  ;;  %v1471_v6 = vperm.slane %v1333_v32, 0  ;;  %v1487_v11 = vperm.slane %v1333_v32, 1  ;;  %v1535_v26 = vperm.slane %v1333_v32, 4  ;;  %v1583_v14 = vperm.slane %v1333_v32, 7 }
 0x355   :  { %1592 = vst.msk [vmem:[#allocation5 + $0xfe] sm:$0x3] %vm1344_vm15, %v1584_v60  ;;  %v1503_v60 = vperm.slane %v1333_v32, 2 }
 0x356   :  { %1478 = vst.msk [vmem:[#allocation5 + $0xb0] sm:$0x3] %vm1344_vm15, %v1470_v3  ;;  %v1519_v3 = vperm.slane %v1333_v32, 3 }
 0x357   :  { %1494 = vst.msk [vmem:[#allocation5 + $0xb2] sm:$0x3] %vm1344_vm15, %v1486_v17  ;;  %v1551_v17 = vperm.slane %v1333_v32, 5 }
 0x358   :  { %1510 = vst.msk [vmem:[#allocation5 + $0xb4] sm:$0x3] %vm1344_vm15, %v1502_v9  ;;  %v1567_v9 = vperm.slane %v1333_v32, 6 }
 0x359   :  { %1526 = vst.msk [vmem:[#allocation5 + $0xb6] sm:$0x3] %vm1344_vm15, %v1518_v39 }
 0x35a   :  { %1542 = vst.msk [vmem:[#allocation5 + $0xb8] sm:$0x3] %vm1344_vm15, %v1534_v27 }
 0x35b   :  { %1558 = vst.msk [vmem:[#allocation5 + $0xba] sm:$0x3] %vm1344_vm15, %v1550_v58 }
 0x35c   :  { %1574 = vst.msk [vmem:[#allocation5 + $0xbc] sm:$0x3] %vm1344_vm15, %v1566_v31 }
 0x35d   :  { %1590 = vst.msk [vmem:[#allocation5 + $0xbe] sm:$0x3] %vm1344_vm15, %v1582_v10 }
 0x35e   :  { %1346 = vst.msk [vmem:[#allocation5 + $0x20] sm:$0x3] %vm1344_vm15, %v1337_v1 }
 0x35f   :  { %1362 = vst.msk [vmem:[#allocation5 + $0x22] sm:$0x3] %vm1344_vm15, %v1354_v2 }
 0x360   :  { %1378 = vst.msk [vmem:[#allocation5 + $0x24] sm:$0x3] %vm1344_vm15, %v1370_v42 }
 0x361   :  { %1394 = vst.msk [vmem:[#allocation5 + $0x26] sm:$0x3] %vm1344_vm15, %v1386_v18 }
 0x362   :  { %1410 = vst.msk [vmem:[#allocation5 + $0x28] sm:$0x3] %vm1344_vm15, %v1402_v24 }
 0x363   :  { %1426 = vst.msk [vmem:[#allocation5 + $0x2a] sm:$0x3] %vm1344_vm15, %v1418_v25 }
 0x364   :  { %1442 = vst.msk [vmem:[#allocation5 + $0x2c] sm:$0x3] %vm1344_vm15, %v1434_v15 }
 0x365   :  { %1458 = vst.msk [vmem:[#allocation5 + $0x2e] sm:$0x3] %vm1344_vm15, %v1450_v54 }
 0x366   :  { %1352 = vst.msk [vmem:[#allocation5 + $0xe0] sm:$0x3] %vm1344_vm15, %v1343_v29 }
 0x367   :  { %1368 = vst.msk [vmem:[#allocation5 + $0xe2] sm:$0x3] %vm1344_vm15, %v1360_v19 }
 0x368   :  { %1384 = vst.msk [vmem:[#allocation5 + $0xe4] sm:$0x3] %vm1344_vm15, %v1376_v46 }
 0x369   :  { %1400 = vst.msk [vmem:[#allocation5 + $0xe6] sm:$0x3] %vm1344_vm15, %v1392_v63 }
 0x36a   :  { %1416 = vst.msk [vmem:[#allocation5 + $0xe8] sm:$0x3] %vm1344_vm15, %v1408_v36 }
 0x36b   :  { %1432 = vst.msk [vmem:[#allocation5 + $0xea] sm:$0x3] %vm1344_vm15, %v1424_v5 }
 0x36c   :  { %1448 = vst.msk [vmem:[#allocation5 + $0xec] sm:$0x3] %vm1344_vm15, %v1440_v7 }
 0x36d   :  { %1464 = vst.msk [vmem:[#allocation5 + $0xee] sm:$0x3] %vm1344_vm15, %v1456_v23 }
 0x36e   :  { %1347 = vst.msk [vmem:[#allocation5 + $0x40] sm:$0x3] %vm1344_vm15, %v1338_v43 }
 0x36f   :  { %1363 = vst.msk [vmem:[#allocation5 + $0x42] sm:$0x3] %vm1344_vm15, %v1355_v62 }
 0x370   :  { %1379 = vst.msk [vmem:[#allocation5 + $0x44] sm:$0x3] %vm1344_vm15, %v1371_v40 }
 0x371   :  { %1395 = vst.msk [vmem:[#allocation5 + $0x46] sm:$0x3] %vm1344_vm15, %v1387_v4 }
 0x372   :  { %1411 = vst.msk [vmem:[#allocation5 + $0x48] sm:$0x3] %vm1344_vm15, %v1403_v34 }
 0x373   :  { %1427 = vst.msk [vmem:[#allocation5 + $0x4a] sm:$0x3] %vm1344_vm15, %v1419_v44 }
 0x374   :  { %1443 = vst.msk [vmem:[#allocation5 + $0x4c] sm:$0x3] %vm1344_vm15, %v1435_v47 }
 0x375   :  { %1459 = vst.msk [vmem:[#allocation5 + $0x4e] sm:$0x3] %vm1344_vm15, %v1451_v37 }
 0x376   :  { %1476 = vst.msk [vmem:[#allocation5 + $0x70] sm:$0x3] %vm1344_vm15, %v1468_v57 }
 0x377   :  { %1492 = vst.msk [vmem:[#allocation5 + $0x72] sm:$0x3] %vm1344_vm15, %v1484_v51 }
 0x378   :  { %1508 = vst.msk [vmem:[#allocation5 + $0x74] sm:$0x3] %vm1344_vm15, %v1500_v45 }
 0x379   :  { %1524 = vst.msk [vmem:[#allocation5 + $0x76] sm:$0x3] %vm1344_vm15, %v1516_v48 }
 0x37a   :  { %1540 = vst.msk [vmem:[#allocation5 + $0x78] sm:$0x3] %vm1344_vm15, %v1532_v49 }
 0x37b   :  { %1556 = vst.msk [vmem:[#allocation5 + $0x7a] sm:$0x3] %vm1344_vm15, %v1548_v35 }
 0x37c   :  { %1572 = vst.msk [vmem:[#allocation5 + $0x7c] sm:$0x3] %vm1344_vm15, %v1564_v33 }
 0x37d   :  { %1588 = vst.msk [vmem:[#allocation5 + $0x7e] sm:$0x3] %vm1344_vm15, %v1580_v56 }
 0x37e   :  { %1350 = vst.msk [vmem:[#allocation5 + $0xa0] sm:$0x3] %vm1344_vm15, %v1341_v21 }
 0x37f   :  { %1366 = vst.msk [vmem:[#allocation5 + $0xa2] sm:$0x3] %vm1344_vm15, %v1358_v50 }
 0x380   :  { %1382 = vst.msk [vmem:[#allocation5 + $0xa4] sm:$0x3] %vm1344_vm15, %v1374_v22 }
 0x381   :  { %1398 = vst.msk [vmem:[#allocation5 + $0xa6] sm:$0x3] %vm1344_vm15, %v1390_v61 }
 0x382   :  { %1414 = vst.msk [vmem:[#allocation5 + $0xa8] sm:$0x3] %vm1344_vm15, %v1406_v12 }
 0x383   :  { %1430 = vst.msk [vmem:[#allocation5 + $0xaa] sm:$0x3] %vm1344_vm15, %v1422_v0 }
 0x384   :  { %1446 = vst.msk [vmem:[#allocation5 + $0xac] sm:$0x3] %vm1344_vm15, %v1438_v41 }
 0x385   :  { %1462 = vst.msk [vmem:[#allocation5 + $0xae] sm:$0x3] %vm1344_vm15, %v1454_v16 }
 0x386   :  { %1479 = vst.msk [vmem:[#allocation5 + $0xd0] sm:$0x3] %vm1344_vm15, %v1471_v6 }
 0x387   :  { %1495 = vst.msk [vmem:[#allocation5 + $0xd2] sm:$0x3] %vm1344_vm15, %v1487_v11 }
 0x388   :  { %1511 = vst.msk [vmem:[#allocation5 + $0xd4] sm:$0x3] %vm1344_vm15, %v1503_v60 }
 0x389   :  { %1527 = vst.msk [vmem:[#allocation5 + $0xd6] sm:$0x3] %vm1344_vm15, %v1519_v3 }
 0x38a   :  { %1543 = vst.msk [vmem:[#allocation5 + $0xd8] sm:$0x3] %vm1344_vm15, %v1535_v26 }
 0x38b   :  { %1559 = vst.msk [vmem:[#allocation5 + $0xda] sm:$0x3] %vm1344_vm15, %v1551_v17 }
 0x38c   :  { %1575 = vst.msk [vmem:[#allocation5 + $0xdc] sm:$0x3] %vm1344_vm15, %v1567_v9 }
 0x38d   :  { %1591 = vst.msk [vmem:[#allocation5 + $0xde] sm:$0x3] %vm1344_vm15, %v1583_v14 }
 0x38e   :  { %1605 = dma.vmem_to_hbm [thread:$0]  %s1598_s13, 4096, %s1600_s16, [#allocation4], %s1749_s11, %s1749_s11, %s1750_s12  }
 0x38f   :  { %1746 = dma.done.wait [#allocation4], 4096  }
 0x390   :  { %1747 = vsyncadd [#allocation4], 4294963200 }
 0x391   :  { %1610 = vsyncpa [#allocation3], 1 }
 0x392   :  { %1611 = vsyncpa [#allocation4], 1 }

</bundles_post_ra>
